<compile_context>
chip_gen: v5e
topology: v5e:2x2
jax: 0.10.0
libtpu: 0.0.40
codegen_flags: <defaults>
</compile_context>

<pallas_src>
import functools
import math

import jax
import jax.numpy as jnp
from jax.experimental import pallas as pl
from jax.experimental.pallas import tpu as pltpu


# --------------------------------------------------------------------------
# Kernel
# --------------------------------------------------------------------------
def ffn_kernel(x_ref, w13_ref, b13_ref, w2_ref, b2_ref, o_ref, acc_ref, *, tk):
    k = pl.program_id(1)

    @pl.when(k == 0)
    def _():
        acc_ref[...] = jnp.zeros_like(acc_ref)

    x = x_ref[...]                          # (tm, dim) bf16
    w13 = w13_ref[0]                        # (dim, 2*tk) bf16, contiguous chunk
    # Fused gate+value projection for this hidden chunk: one MXU sequence.
    h13 = jnp.dot(x, w13, preferred_element_type=jnp.float32) + b13_ref[0]
    h1 = h13[:, :tk]                        # gate
    h3 = h13[:, tk:]                        # value
    # SwiGLU elementwise math in f32 (sigmoid -> EUP, muls -> VPU).
    h = (h1 * jax.nn.sigmoid(h1)) * h3

    # Partial contribution of this hidden chunk to the output (f32 accum).
    acc_ref[...] += jnp.dot(h.astype(w2_ref.dtype), w2_ref[...],
                            preferred_element_type=jnp.float32)

    @pl.when(k == pl.num_programs(1) - 1)
    def _():
        # b2 added exactly once, in the epilogue; lane-dense bf16 store.
        o_ref[...] = (acc_ref[...] + b2_ref[...]).astype(o_ref.dtype)


# --------------------------------------------------------------------------
# Tiling heuristics (per TPU generation)
# --------------------------------------------------------------------------
def _device_defaults():
    """Returns (tm, tk, vmem_limit_bytes, has_two_tensorcores)."""
    kind = ""
    try:
        kind = jax.devices()[0].device_kind.lower()
    except Exception:
        pass
    if "v5 lite" in kind or "v5e" in kind or "v5lite" in kind:
        # v5e: ~240 flops/byte roofline -> tm=256 suffices; grow tk instead.
        return 256, 1024, 100 * 1024 * 1024, False
    if "v6" in kind:
        # v6e: ~650 flops/byte needed -> big token tile; 128 MiB VMEM.
        return 768, 512, 100 * 1024 * 1024, False
    if "7" in kind:
        # v7x: 64 MiB VMEM, ~310 flops/byte, 2 TensorCores per chip.
        return 512, 256, 52 * 1024 * 1024, True
    # Unknown (v4/v5p/...): conservative middle ground.
    return 512, 512, 64 * 1024 * 1024, False


def _pick_tile(n, target, multiple):
    """Largest t <= target with n % t == 0 and t % multiple == 0 (or t == n)."""
    if n <= target:
        return n
    t = (target // multiple) * multiple
    while t >= multiple:
        if n % t == 0:
            return t
        t -= multiple
    return n  # no aligned divisor: single full block


def choose_tiles(M, hidden, tm=None, tk=None, vmem_limit_bytes=None):
    d_tm, d_tk, d_vmem, two_cores = _device_defaults()
    tm = tm if tm is not None else _pick_tile(M, d_tm, 16)
    tk = tk if tk is not None else _pick_tile(hidden, d_tk, 128)
    vmem_limit_bytes = vmem_limit_bytes if vmem_limit_bytes is not None else d_vmem
    # v7x megacore balance: prefer an even number of token tiles so both
    # TensorCores get equal work; only split if tm stays MXU-sized.
    if two_cores and (M // tm) % 2 == 1 and tm % 32 == 0 and tm >= 512:
        tm //= 2
    return tm, tk, vmem_limit_bytes


# --------------------------------------------------------------------------
# Weight fusion (do ONCE at weight-load time, not per forward call)
# --------------------------------------------------------------------------
def fuse_gate_weights(w1, b1, w3, b3, tk):
    """Interleave W1/W3 per hidden chunk into a pre-blocked fused weight.

    w1, w3: [dim, hidden];  b1, b3: [1, hidden]
    returns w13: [hidden//tk, dim, 2*tk]  (chunk k = [W1_k | W3_k], contiguous)
            b13: [hidden//tk, 1, 2*tk]
    """
    dim, hidden = w1.shape
    assert hidden % tk == 0
    nk = hidden // tk
    w13 = jnp.concatenate(
        [w1.reshape(dim, nk, tk), w3.reshape(dim, nk, tk)], axis=2)
    w13 = jnp.transpose(w13, (1, 0, 2))                     # (nk, dim, 2*tk)
    b13 = jnp.concatenate(
        [b1.reshape(nk, 1, tk), b3.reshape(nk, 1, tk)], axis=2)  # (nk, 1, 2*tk)
    return w13, b13


# --------------------------------------------------------------------------
# Pallas wrappers
# --------------------------------------------------------------------------
@functools.partial(jax.jit, static_argnames=("tm", "tk", "vmem_limit_bytes"))
def feedforward_fused(x, w13, b13, w2, b2, *, tm, tk, vmem_limit_bytes):
    """x: [..., dim]; w13: [nk, dim, 2*tk]; b13: [nk, 1, 2*tk];
    w2: [hidden, dim]; b2: [1, dim]."""
    lead = x.shape[:-1]
    dim = x.shape[-1]
    x2 = x.reshape(-1, dim)
    M = x2.shape[0]
    nk = w13.shape[0]
    hidden = nk * tk

    assert w13.shape == (nk, dim, 2 * tk)
    assert b13.shape == (nk, 1, 2 * tk)
    assert w2.shape == (hidden, dim) and b2.shape == (1, dim)
    assert M % tm == 0
    assert dim % 128 == 0 and tk % 128 == 0 and tm % 8 == 0

    grid = (M // tm, nk)

    itemsize = lambda a: a.dtype.itemsize
    cost = pl.CostEstimate(
        flops=6 * M * dim * hidden,
        transcendentals=M * hidden,
        bytes_accessed=int(x2.size * itemsize(x2)
                           + w13.size * itemsize(w13)
                           + w2.size * itemsize(w2)
                           + b13.size * itemsize(b13)
                           + b2.size * itemsize(b2)
                           + M * dim * itemsize(x2)))

    out = pl.pallas_call(
        functools.partial(ffn_kernel, tk=tk),
        out_shape=jax.ShapeDtypeStruct((M, dim), x.dtype),
        grid_spec=pltpu.PrefetchScalarGridSpec(
            num_scalar_prefetch=0,
            grid=grid,
            in_specs=[
                pl.BlockSpec((tm, dim), lambda i, k: (i, 0)),        # x tile
                pl.BlockSpec((1, dim, 2 * tk), lambda i, k: (k, 0, 0)),  # fused W1|W3 chunk
                pl.BlockSpec((1, 1, 2 * tk), lambda i, k: (k, 0, 0)),    # fused b1|b3 chunk
                pl.BlockSpec((tk, dim), lambda i, k: (k, 0)),        # W2 chunk
                pl.BlockSpec((1, dim), lambda i, k: (0, 0)),         # b2 (invariant)
            ],
            out_specs=pl.BlockSpec((tm, dim), lambda i, k: (i, 0)),
            scratch_shapes=[pltpu.VMEM((tm, dim), jnp.float32)],
        ),
        compiler_params=pltpu.CompilerParams(
            dimension_semantics=("parallel", "arbitrary"),
            vmem_limit_bytes=vmem_limit_bytes),
        cost_estimate=cost,
    )(x2, w13, b13, w2, b2)

    return out.reshape(*lead, dim)


def feedforward_pallas(x, w1, b1, w2, b2, w3, b3, *, tm=None, tk=None,
                       vmem_limit_bytes=None):
    """Convenience wrapper matching the PyTorch module's parameter layout.

    Weights stored pre-transposed as [in, out] so y = x @ W + b.  In real use
    fuse_gate_weights() should be hoisted to weight-load time; it is done here
    per call only for convenience.
    """
    dim = x.shape[-1]
    hidden = w1.shape[1]
    M = math.prod(x.shape[:-1])
    tm, tk, vmem_limit_bytes = choose_tiles(M, hidden, tm, tk, vmem_limit_bytes)
    w13, b13 = fuse_gate_weights(w1, b1, w3, b3, tk)
    return feedforward_fused(x, w13, b13, w2, b2, tm=tm, tk=tk,
                             vmem_limit_bytes=vmem_limit_bytes)


def feedforward_ref(x, w1, b1, w2, b2, w3, b3):
    """Pure-JAX reference mirroring the kernel's dtype policy."""
    lead = x.shape[:-1]
    dim = x.shape[-1]
    x2 = x.reshape(-1, dim)
    h1 = jnp.dot(x2, w1, preferred_element_type=jnp.float32) + b1
    h3 = jnp.dot(x2, w3, preferred_element_type=jnp.float32) + b3
    h = (h1 * jax.nn.sigmoid(h1)) * h3
    out = jnp.dot(h.astype(w2.dtype), w2, preferred_element_type=jnp.float32) + b2
    return out.astype(x.dtype).reshape(*lead, dim)


if __name__ == "__main__":
    # Small shapes consistent with the module (dim / hidden_dim scaled down,
    # but large enough to exercise both grid axes and MXU-sized tiles).
    batch, seq = 2, 128
    dim, hidden_dim = 128, 512
    act_dtype = jnp.bfloat16

    key = jax.random.PRNGKey(0)
    kx, k1, k2, k3, kb1, kb2, kb3 = jax.random.split(key, 7)

    x = jax.random.normal(kx, (batch, seq, dim), dtype=jnp.float32).astype(act_dtype)

    # PyTorch-Linear-like uniform init; weights stored transposed as [in, out].
    # Matmul operands in bf16 (MXU-native), biases kept in f32.
    s1 = 1.0 / jnp.sqrt(dim)
    s2 = 1.0 / jnp.sqrt(hidden_dim)
    w1 = jax.random.uniform(k1, (dim, hidden_dim), minval=-s1, maxval=s1).astype(act_dtype)
    b1 = jax.random.uniform(kb1, (1, hidden_dim), minval=-s1, maxval=s1, dtype=jnp.float32)
    w3 = jax.random.uniform(k3, (dim, hidden_dim), minval=-s1, maxval=s1).astype(act_dtype)
    b3 = jax.random.uniform(kb3, (1, hidden_dim), minval=-s1, maxval=s1, dtype=jnp.float32)
    w2 = jax.random.uniform(k2, (hidden_dim, dim), minval=-s2, maxval=s2).astype(act_dtype)
    b2 = jax.random.uniform(kb2, (1, dim), minval=-s2, maxval=s2, dtype=jnp.float32)

    ref = feedforward_ref(x, w1, b1, w2, b2, w3, b3)

    # 1) Explicit small tiles: tm=128 -> 2 token blocks, tk=256 -> 2 hidden
    #    chunks; exercises both grid axes and the accumulator init/finalize.
    out = feedforward_pallas(x, w1, b1, w2, b2, w3, b3, tm=128, tk=256)
    out = jax.block_until_ready(out)
    assert out.shape == (batch, seq, dim)
    assert jnp.allclose(out.astype(jnp.float32), ref.astype(jnp.float32),
                        atol=5e-2, rtol=5e-2), "mismatch vs reference (manual tiles)"

    # 2) Device-tuned default tiles (per-generation heuristics above).
    out_auto = feedforward_pallas(x, w1, b1, w2, b2, w3, b3)
    out_auto = jax.block_until_ready(out_auto)
    assert jnp.allclose(out_auto.astype(jnp.float32), ref.astype(jnp.float32),
                        atol=5e-2, rtol=5e-2), "mismatch vs reference (auto tiles)"

    print("KERNEL_OK")
</pallas_src>

<mosaic_0001>
module attributes {stable_mosaic.version = 11 : i64} {
  func.func @ffn_kernel(%arg0: i32, %arg1: i32, %arg2: memref<128x128xbf16, #tpu.memory_space<vmem>>, %arg3: memref<1x128x512xbf16, #tpu.memory_space<vmem>>, %arg4: memref<1x1x512xf32, #tpu.memory_space<vmem>>, %arg5: memref<256x128xbf16, #tpu.memory_space<vmem>>, %arg6: memref<1x128xf32, #tpu.memory_space<vmem>>, %arg7: memref<128x128xbf16, #tpu.memory_space<vmem>>, %arg8: memref<128x128xf32, #tpu.memory_space<vmem>>) attributes {dimension_semantics = [#tpu.dimension_semantics<parallel>, #tpu.dimension_semantics<arbitrary>], iteration_bounds = array<i64: 2, 2>, scalar_prefetch = 0 : i64, scratch_operands = 1 : i64, tpu.core_type = #tpu.core_type<tc>, window_params = [{transform_indices = @transform_0, window_bounds = array<i64: 128, 128>}, {transform_indices = @transform_1, window_bounds = array<i64: 1, 128, 512>}, {transform_indices = @transform_2, window_bounds = array<i64: 1, 1, 512>}, {transform_indices = @transform_3, window_bounds = array<i64: 256, 128>}, {pipeline_mode = #tpu.pipeline_mode<synchronous>, transform_indices = @transform_4, window_bounds = array<i64: 1, 128>}, {transform_indices = @transform_5, window_bounds = array<i64: 128, 128>}]} {
    %c0_i32 = arith.constant 0 : i32
    %0 = arith.cmpi eq, %arg1, %c0_i32 : i32
    %1 = arith.extui %0 : i1 to i32
    %c0_i32_0 = arith.constant 0 : i32
    %2 = arith.cmpi ne, %1, %c0_i32_0 : i32
    scf.if %2 {
      %cst_17 = arith.constant 0.000000e+00 : f32
      %29 = vector.broadcast %cst_17 : f32 to vector<128x128xf32>
      %c0_18 = arith.constant 0 : index
      %c0_19 = arith.constant 0 : index
      %30 = vector.load %arg8[%c0_18, %c0_19] : memref<128x128xf32, #tpu.memory_space<vmem>>, vector<128x128xf32>
      tpu.vector_store %arg8[%c0_18, %c0_19], %29 {strides = array<i32>} : memref<128x128xf32, #tpu.memory_space<vmem>>, vector<128x128xf32>,
    } else {
    }
    %c0 = arith.constant 0 : index
    %c0_1 = arith.constant 0 : index
    %3 = vector.load %arg2[%c0, %c0_1] : memref<128x128xbf16, #tpu.memory_space<vmem>>, vector<128x128xbf16>
    %c0_2 = arith.constant 0 : index
    %c0_3 = arith.constant 0 : index
    %c0_4 = arith.constant 0 : index
    %4 = vector.load %arg3[%c0_2, %c0_3, %c0_4] : memref<1x128x512xbf16, #tpu.memory_space<vmem>>, vector<1x128x512xbf16>
    %5 = vector.shape_cast %4 : vector<1x128x512xbf16> to vector<128x512xbf16>
    %cst = arith.constant dense<0.000000e+00> : vector<128x512xf32>
    %6 = tpu.matmul %3, %5, %cst {dimension_numbers = #tpu.dot_dimension_numbers<[1], [0], [0], [1], [0, 0, 1, 1], [], []>} : vector<128x128xbf16>, vector<128x512xbf16>, vector<128x512xf32> -> vector<128x512xf32>
    %c0_5 = arith.constant 0 : index
    %c0_6 = arith.constant 0 : index
    %c0_7 = arith.constant 0 : index
    %7 = vector.load %arg4[%c0_5, %c0_6, %c0_7] : memref<1x1x512xf32, #tpu.memory_space<vmem>>, vector<1x1x512xf32>
    %8 = vector.shape_cast %7 : vector<1x1x512xf32> to vector<1x512xf32>
    %9 = vector.broadcast %8 : vector<1x512xf32> to vector<128x512xf32>
    %10 = arith.addf %6, %9 : vector<128x512xf32>
    %11 = vector.extract_strided_slice %10 {offsets = [0, 0], sizes = [128, 256], strides = [1, 1]} : vector<128x512xf32> to vector<128x256xf32>
    %12 = vector.extract_strided_slice %10 {offsets = [0, 256], sizes = [128, 256], strides = [1, 1]} : vector<128x512xf32> to vector<128x256xf32>
    %13 = arith.negf %11 : vector<128x256xf32>
    %14 = math.exp %13 : vector<128x256xf32>
    %cst_8 = arith.constant 1.000000e+00 : f32
    %15 = vector.broadcast %cst_8 : f32 to vector<128x256xf32>
    %16 = arith.addf %15, %14 : vector<128x256xf32>
    %17 = arith.divf %15, %16 : vector<128x256xf32>
    %18 = arith.mulf %11, %17 : vector<128x256xf32>
    %19 = arith.mulf %18, %12 : vector<128x256xf32>
    %c0_9 = arith.constant 0 : index
    %c0_10 = arith.constant 0 : index
    %20 = vector.load %arg8[%c0_9, %c0_10] : memref<128x128xf32, #tpu.memory_space<vmem>>, vector<128x128xf32>
    %21 = arith.truncf %19 : vector<128x256xf32> to vector<128x256xbf16>
    %c0_11 = arith.constant 0 : index
    %c0_12 = arith.constant 0 : index
    %22 = vector.load %arg5[%c0_11, %c0_12] : memref<256x128xbf16, #tpu.memory_space<vmem>>, vector<256x128xbf16>
    %cst_13 = arith.constant dense<0.000000e+00> : vector<128x128xf32>
    %23 = tpu.matmul %21, %22, %cst_13 {dimension_numbers = #tpu.dot_dimension_numbers<[1], [0], [0], [1], [0, 0, 1, 1], [], []>} : vector<128x256xbf16>, vector<256x128xbf16>, vector<128x128xf32> -> vector<128x128xf32>
    %24 = arith.addf %20, %23 : vector<128x128xf32>
    %c0_14 = arith.constant 0 : index
    %c0_15 = arith.constant 0 : index
    %25 = vector.load %arg8[%c0_14, %c0_15] : memref<128x128xf32, #tpu.memory_space<vmem>>, vector<128x128xf32>
    tpu.vector_store %arg8[%c0_14, %c0_15], %24 {strides = array<i32>} : memref<128x128xf32, #tpu.memory_space<vmem>>, vector<128x128xf32>,
    %c1_i32 = arith.constant 1 : i32
    %26 = arith.cmpi eq, %arg1, %c1_i32 : i32
    %27 = arith.extui %26 : i1 to i32
    %c0_i32_16 = arith.constant 0 : i32
    %28 = arith.cmpi ne, %27, %c0_i32_16 : i32
    scf.if %28 {
      %c0_17 = arith.constant 0 : index
      %c0_18 = arith.constant 0 : index
      %29 = vector.load %arg8[%c0_17, %c0_18] : memref<128x128xf32, #tpu.memory_space<vmem>>, vector<128x128xf32>
      %c0_19 = arith.constant 0 : index
      %c0_20 = arith.constant 0 : index
      %30 = vector.load %arg6[%c0_19, %c0_20] : memref<1x128xf32, #tpu.memory_space<vmem>>, vector<1x128xf32>
      %31 = vector.broadcast %30 : vector<1x128xf32> to vector<128x128xf32>
      %32 = arith.addf %29, %31 : vector<128x128xf32>
      %33 = arith.truncf %32 : vector<128x128xf32> to vector<128x128xbf16>
      %c0_21 = arith.constant 0 : index
      %c0_22 = arith.constant 0 : index
      %34 = vector.load %arg7[%c0_21, %c0_22] : memref<128x128xbf16, #tpu.memory_space<vmem>>, vector<128x128xbf16>
      tpu.vector_store %arg7[%c0_21, %c0_22], %33 {strides = array<i32>} : memref<128x128xbf16, #tpu.memory_space<vmem>>, vector<128x128xbf16>,
    } else {
    }
    return
  }
  func.func @transform_0(%arg0: i32, %arg1: i32) -> (i32, i32) {
    %c0_i32 = arith.constant 0 : i32
    %c0_i32_0 = arith.constant 0 : i32
    return %arg0, %c0_i32 : i32, i32
  }
  func.func @transform_1(%arg0: i32, %arg1: i32) -> (i32, i32, i32) {
    %c0_i32 = arith.constant 0 : i32
    %c0_i32_0 = arith.constant 0 : i32
    %c0_i32_1 = arith.constant 0 : i32
    return %arg1, %c0_i32, %c0_i32_0 : i32, i32, i32
  }
  func.func @transform_2(%arg0: i32, %arg1: i32) -> (i32, i32, i32) {
    %c0_i32 = arith.constant 0 : i32
    %c0_i32_0 = arith.constant 0 : i32
    %c0_i32_1 = arith.constant 0 : i32
    return %arg1, %c0_i32, %c0_i32_0 : i32, i32, i32
  }
  func.func @transform_3(%arg0: i32, %arg1: i32) -> (i32, i32) {
    %c0_i32 = arith.constant 0 : i32
    %c0_i32_0 = arith.constant 0 : i32
    return %arg1, %c0_i32 : i32, i32
  }
  func.func @transform_4(%arg0: i32, %arg1: i32) -> (i32, i32) {
    %c0_i32 = arith.constant 0 : i32
    %c0_i32_0 = arith.constant 0 : i32
    %c0_i32_1 = arith.constant 0 : i32
    return %c0_i32, %c0_i32_0 : i32, i32
  }
  func.func @transform_5(%arg0: i32, %arg1: i32) -> (i32, i32) {
    %c0_i32 = arith.constant 0 : i32
    %c0_i32_0 = arith.constant 0 : i32
    return %arg0, %c0_i32 : i32, i32
  }
}

</mosaic_0001>

<bundles_post_ra>
// kernel: feedforward_fused.1
= control target key start
LH: loop header
LB: loop body
LE: loop exit
PB: predicated region body
PF: predicated region fallthrough
CT: control target
= control target key end

     0   :  { %s4705_s0 = inlined_call_operand.hbm [shape: bf16[256,128], index: 0, kind: input, shape index: {}]   ;;  %s4706_s1 = inlined_call_operand.hbm [shape: bf16[2,128,512], index: 1, kind: input, shape index: {}]   ;;  %s4707_s2 = inlined_call_operand.hbm [shape: f32[2,1,512], index: 2, kind: input, shape index: {}]   ;;  %s4708_s3 = inlined_call_operand.hbm [shape: bf16[512,128], index: 3, kind: input, shape index: {}]   ;;  %s4709_s4 = inlined_call_operand.vmem [shape: f32[1,128], index: 4, kind: input, shape index: {}]   ;;  %s4710_s5 = inlined_call_operand.hbm [shape: bf16[256,128], index: 5, kind: output, shape index: {}]  }
   0x1   :  { %4733 = sst [smem:[#allocation49_spill]] %s4705_s0 }
   0x2   :  { %4734 = sst [smem:[#allocation50_spill]] %s4706_s1 }
   0x3   :  { %4735 = sst [smem:[#allocation51_spill]] %s4709_s4 }
   0x4   :  { %4736 = sst [smem:[#allocation52_spill]] %s4710_s5 }
   0x5   :  { %10 = vsyncpa [#allocation4], 0 }
   0x6   :  { %12 = vsyncpa [#allocation4 + $0x1], 0 }
   0x7   :  { %13 = vsyncpa [#allocation7], 0 }
   0x8   :  { %15 = vsyncpa [#allocation7 + $0x1], 0 }
   0x9   :  { %16 = vsyncpa [#allocation10], 0 }
   0xa   :  { %18 = vsyncpa [#allocation10 + $0x1], 0 }
   0xb   :  { %19 = vsyncpa [#allocation5], 0 }
   0xc   :  { %21 = vsyncpa [#allocation5 + $0x1], 0  ;;  %s3011_s18 = smov 0   ;;  %s3013_s19 = smov 0  }
   0xd   :  { %s3015_s20 = smov 0   ;;  %s3017_s21 = smov 0  }
   0xe   :  { %s3019_s22 = smov 0   ;;  %s3021_s23 = smov 0  }
   0xf   :  { %s3023_s24 = smov 0   ;;  %s3025_s25 = smov 0  }
  0x10   :  { %s3027_s26 = smov 0   ;;  %s3029_s27 = smov 0  }
  0x11   :  { %s3031_s28 = smov 0  }
  0x12 LB: > { %4737 = sst [smem:[#allocation16_spill]] %s2940_s20  ;;  %s36_s29 = sadd.s32 1, %s2964_s26  ;;  %s2972_s28 = sphi %s3031_s28, %s27_s28   ;;  %s2968_s27 = sphi %s3029_s27, %s4930_s27   ;;  %s2964_s26 = sphi %s3027_s26, %s4936_s26   ;;  %s2960_s25 = sphi %s3025_s25, %s4928_s25   ;;  %s2956_s24 = sphi %s3023_s24, %s4935_s24   ;;  %s2952_s23 = sphi %s3021_s23, %s4927_s23   ;;  %s2948_s22 = sphi %s3019_s22, %s4934_s22   ;;  %s2944_s21 = sphi %s3017_s21, %s4933_s21   ;;  %s2940_s20 = sphi %s3015_s20, %s4925_s20   ;;  %s2936_s19 = sphi %s3013_s19, %s4932_s19   ;;  %s2932_s18 = sphi %s3011_s18, %s4931_s18  }
  0x13   : > { %4738 = sst [smem:[#allocation17_spill]] %s2944_s21  ;;  %p54_p0 = scmp.eq.s32.totalorder %s2972_s28, 0 }
  0x14   : > { %4739 = sst [smem:[#allocation18_spill]] %s2952_s23  ;;  %p3068_p1 = scmp.ge.s32.totalorder %s36_s29, 2 }
  0x15   : > { %4740 = sst [smem:[#allocation19_spill]] %s2956_s24  ;;  %s72_s6 = sadd.s32 1, %s2940_s20 }
  0x16   : > { %4741 = sst [smem:[#allocation20_spill]] %s2960_s25  ;;  %p79_p2 = scmp.ne.s32.totalorder %s2940_s20, %s2936_s19 }
  0x17   : > { %4742 = sst [smem:[#allocation21_spill]] %s2968_s27  ;;  %p85_p3 = scmp.ne.s32.totalorder %s2936_s19, %s2932_s18 }
  0x18   : > { %s4938_s29 = smov (%p3068_p1, %s36_s29), 0  ;;  %p3083_p4 = por %p79_p2, %p54_p0 }
  0x19   : > { %4744 = sst [smem:[#allocation22_spill]] %s4938_s29  ;;  %s69_s8 = ssub.s32 %s2964_s26, %s4938_s29 }
  0x1a   : > { %p2496_p5 = scmp.lt.s32.totalorder %s2972_s28, 4  ;;  %p70_p6 = scmp.eq.s32.totalorder %s69_s8, 0 }
  0x1b   : > { %s233_s9 = sand.u32 1, %s2972_s28   ;;  %s3092_s10 = sand.u32 1, %s2940_s20  }
  0x1c   : > { %s3095_s11 = scalar_select %p70_p6, %s2940_s20, %s72_s6  }
  0x1d   : > { %s2069_s12 = sshll.u32 %s3092_s10, 8  ;;  %s2347_s13 = sshll.u32 %s2964_s26, 8 }
  0x1e   : > { %4746 = sst [smem:[#allocation23_spill]] %s3095_s11  ;;  %s237_s29 = scalar_lea.vmem [#allocation6], %s2069_s12 }
  0x1f   : > { %s4747_s1 = sld [smem:[#allocation50_spill]]  ;;  %s245_s8 = sshll.u32 %s237_s29, 4  ;;  %s246_s8 = int_to_ptr.vmem [resolvable:$true] %s245_s8 }
  0x20   : > { %p3106_p7 = pnand %p2496_p5, %p3083_p4  ;;  %p2077_p8 = scmp.ge.s32.totalorder %s2972_s28, 1 }
  0x21   : > { %p294_p9 = scmp.lt.s32.totalorder %s2972_s28, 5  ;;  %s2974_s29 = smov 256  }
  0x22   : > { %s2975_s7 = smov 16   ;;  %s3122_s14 = sadd.s32 4294967295, %s2972_s28  }
  0x23   : > { %p3117_p10 = pnand %p2077_p8, %p294_p9  ;;  %s39_s15 = sadd.s32 1, %s2968_s27 }
  0x24   : > { %s4940_s15 = smov (!%p3068_p1, %s39_s15), %s2968_s27  ;;  %p53_p11 = scmp.ne.s32.totalorder %s2952_s23, %s2948_s22 }
  0x25   : > { %s242_s16 = scalar_lea.hbm %s4747_s1, %s2347_s13  ;;  %s3112_s13 = scalar_lea.sflag [#allocation7], %s233_s9 }
  0x26   : > { %s243_s17 = sshll.u32 %s242_s16, 4  ;;  %s2063_s9 = sadd.s32 4294967294, %s2972_s28   ;;  %s244_s17 = int_to_ptr.hbm [resolvable:$true] %s243_s17 }
  0x27   : > { %2485 = dma.hbm_to_vmem [thread:$0]  (!%p3106_p7), %s244_s17, 4096, %s246_s8, %s3112_s13, %s2974_s29, %s2974_s29, %s2975_s7  }
  0x28   : > { %s46_s16 = sadd.s32 1, %s2952_s23  ;;  %p41_p12 = scmp.ge.s32.totalorder %s4940_s15, 2 }
  0x29   : > { %p59_p13 = scmp.ne.s32.totalorder %s2948_s22, %s2944_s21  ;;  %p3136_p2 = por %p54_p0, %p53_p11 }
  0x2a   : > { %p60_p4 = scmp.eq.s32.totalorder %s3122_s14, 0  ;;  %s4942_s15 = smov (%p41_p12, %s4940_s15), 0 }
  0x2b   : > { %4751 = sst [smem:[#allocation24_spill]] %s4942_s15  ;;  %s43_s29 = ssub.s32 %s2968_s27, %s4942_s15 }
  0x2c   : > { %p3146_p6 = por %p60_p4, %p59_p13  ;;  %p3153_p1 = por %p85_p3, %p60_p4 }
  0x2d   : > { %p182_p0 = scmp.eq.s32.totalorder %s3122_s14, 3  ;;  %p44_p8 = scmp.eq.s32.totalorder %s43_s29, 0 }
  0x2e   : > { %p188_p9 = scmp.eq.s32.totalorder %s2063_s9, 3  ;;  %s211_s1 = sand.u32 1, %s2952_s23  }
  0x2f   : > { %p3160_p12 = por %p182_p0, %p53_p11  ;;  %s2066_s15 = sshll.u32 %s211_s1, 6 }
  0x30   : > { %s3166_s11 = scalar_select %p44_p8, %s2952_s23, %s46_s16  }
  0x31   : > { %p3171_p3 = por %p188_p9, %p59_p13  ;;  %s2346_s20 = sshll.u32 %s2968_s27, 6 }
  0x32   : > { %4755 = sst [smem:[#allocation25_spill]] %s3166_s11  ;;  %s215_s4 = scalar_lea.vmem [#allocation3], %s2066_s15 }
  0x33   : > { %s4756_s18 = scalar_select %p3171_p3, 1, 0 }
  0x34   : > { %s4758_s0 = sld [smem:[#allocation49_spill]]  ;;  %s223_s24 = sshll.u32 %s215_s4, 4  ;;  %s224_s24 = int_to_ptr.vmem [resolvable:$true] %s223_s24 }
  0x35   : > { %4757 = sst [smem:[#allocation26_spill]] %s4756_s18  ;;  %p2480_p11 = pnand %p2496_p5, %p3136_p2 }
  0x36   : > { %s2072_s16 = sshll.u32 %s3092_s10, 2  ;;  %s212_s11 = scalar_lea.sflag [#allocation4], %s211_s1 }
  0x37   : > { %s2976_s23 = smov 64   ;;  %s2977_s27 = smov 4  }
  0x38   : > { %s2073_s18 = sshll.u32 %s2964_s26, 2  ;;  %s259_s5 = scalar_lea.vmem [#allocation8], %s2072_s16 }
  0x39   : > { %s263_s15 = scalar_lea.hbm %s4707_s2, %s2073_s18  ;;  %s2074_s17 = sshll.u32 %s3092_s10, 7 }
  0x3a   : > { %s220_s29 = scalar_lea.hbm %s4758_s0, %s2346_s20  ;;  %s267_s20 = sshll.u32 %s259_s5, 4  ;;  %s268_s20 = int_to_ptr.vmem [resolvable:$true] %s267_s20 }
  0x3b   : > { %s221_s9 = sshll.u32 %s220_s29, 4  ;;  %s265_s29 = sshll.u32 %s263_s15, 4  ;;  %s222_s9 = int_to_ptr.hbm [resolvable:$true] %s221_s9  ;;  %s266_s29 = int_to_ptr.hbm [resolvable:$true] %s265_s29 }
  0x3c   : > { %2482 = dma.hbm_to_vmem [thread:$0]  (!%p2480_p11), %s222_s9, 1024, %s224_s24, %s212_s11, %s2976_s23, %s2976_s23, %s2977_s27  }
  0x3d   : > { %2488 = dma.hbm_to_vmem [thread:$0]  (!%p3106_p7), %s266_s29, 64, %s268_s20, %s3112_s13  }
  0x3e   : > { %s2348_s0 = sshll.u32 %s2964_s26, 7  ;;  %s278_s11 = scalar_lea.vmem [#allocation9], %s2074_s17 }
  0x3f   : > { %s283_s24 = scalar_lea.hbm %s4708_s3, %s2348_s0  ;;  %s286_s9 = sshll.u32 %s278_s11, 4  ;;  %s287_s9 = int_to_ptr.vmem [resolvable:$true] %s286_s9 }
  0x40   : > { %s284_s16 = sshll.u32 %s283_s24, 4  ;;  %s275_s5 = scalar_lea.sflag [#allocation10], %s3092_s10  ;;  %s285_s16 = int_to_ptr.hbm [resolvable:$true] %s284_s16 }
  0x41   : > { %2491 = dma.hbm_to_vmem [thread:$0]  (!%p3106_p7), %s285_s16, 2048, %s287_s9, %s275_s5, %s2976_s23, %s2976_s23, %s2977_s27  }
  0x42   : > { %298 = sbr.rel (%p3117_p10) target bundleno = 674 (0x2a2), region = 40 }
  0x47   : > { %s3202_s18 = sand.u32 1, %s2948_s22  }
  0x48   : > { %s2078_s13 = sshll.u32 %s3202_s18, 6  ;;  %s301_s21 = scalar_lea.sflag [#allocation4], %s3202_s18 }
  0x49   : > { %s3206_s0 = scalar_lea.vmem [#allocation3], %s2078_s13 }
  0x4a   : > { %2915 = dma.done.wait (%p3146_p6), %s301_s21, 1024  }
  0x4b   : > { %2917 = vsyncadd (%p3146_p6), %s301_s21, 4294966272  ;;  %s310_s23 = sand.u32 1, %s3122_s14   ;;  %s312_s27 = sand.u32 1, %s2936_s19  }
  0x4c   : > { %s2079_s10 = sshll.u32 %s312_s27, 8  ;;  %s311_s6 = scalar_lea.sflag [#allocation7], %s310_s23 }
  0x4d   : > { %s3214_s12 = scalar_lea.vmem [#allocation6], %s2079_s10 }
  0x4e   : > { %2919 = dma.done.wait (%p3153_p1), %s311_s6, 4160  }
  0x4f   : > { %2921 = vsyncadd (%p3153_p1), %s311_s6, 4294963136  ;;  %s2080_s20 = sshll.u32 %s312_s27, 2  ;;  %s2081_s4 = sshll.u32 %s312_s27, 7 }
  0x50   : > { %s3220_s25 = scalar_lea.vmem [#allocation8], %s2080_s20  ;;  %s331_s30 = scalar_lea.sflag [#allocation10], %s312_s27 }
  0x51   : > { %s3222_s15 = scalar_lea.vmem [#allocation9], %s2081_s4 }
  0x52   : > { %2923 = dma.done.wait (%p3153_p1), %s331_s30, 2048  }
  0x53   : > { %2925 = vsyncadd (%p3153_p1), %s331_s30, 4294965248  ;;  %s3228_s14 = scalar_lea.vmem [#allocation11], %s2078_s13  ;;  %s4759_s29 = sld [smem:[#allocation19_spill]] }
  0x59   : > { %p2083_p5 = scmp.ne.s32.totalorder %s4759_s29, 0 }
  0x5b   : > { %383 = sbr.rel (%p2083_p5) target bundleno = 113 (0x71), region = 60 }
  0x60   : > { %v2978_v0 = vmov 0.0  }
  0x61   : > { %384 = vst [vmem:[#allocation2 + $0x30] sm:$0xff] %v2978_v0 }
  0x62   : > { %385 = vst [vmem:[#allocation2] sm:$0xff] %v2978_v0 }
  0x63   : > { %386 = vst [vmem:[#allocation2 + $0x58] sm:$0xff] %v2978_v0 }
  0x64   : > { %387 = vst [vmem:[#allocation2 + $0x18] sm:$0xff] %v2978_v0 }
  0x65   : > { %388 = vst [vmem:[#allocation2 + $0x50] sm:$0xff] %v2978_v0 }
  0x66   : > { %389 = vst [vmem:[#allocation2 + $0x68] sm:$0xff] %v2978_v0 }
  0x67   : > { %390 = vst [vmem:[#allocation2 + $0x8] sm:$0xff] %v2978_v0 }
  0x68   : > { %391 = vst [vmem:[#allocation2 + $0x48] sm:$0xff] %v2978_v0 }
  0x69   : > { %392 = vst [vmem:[#allocation2 + $0x40] sm:$0xff] %v2978_v0 }
  0x6a   : > { %393 = vst [vmem:[#allocation2 + $0x20] sm:$0xff] %v2978_v0 }
  0x6b   : > { %394 = vst [vmem:[#allocation2 + $0x10] sm:$0xff] %v2978_v0 }
  0x6c   : > { %395 = vst [vmem:[#allocation2 + $0x38] sm:$0xff] %v2978_v0 }
  0x6d   : > { %396 = vst [vmem:[#allocation2 + $0x60] sm:$0xff] %v2978_v0 }
  0x6e   : > { %397 = vst [vmem:[#allocation2 + $0x70] sm:$0xff] %v2978_v0 }
  0x6f   : > { %398 = vst [vmem:[#allocation2 + $0x78] sm:$0xff] %v2978_v0 }
  0x70   : > { %399 = vst [vmem:[#allocation2 + $0x28] sm:$0xff] %v2978_v0 }
  0x71 PF: > { %v2230_v1 = vld [vmem:[%s3214_s12 + $0xe0] sm:$0xf]  ;;  %v2387_v2 = vld [vmem:[%s3214_s12 + $0xec] sm:$0xf0]  ;;  %v2385_v3 = vld [vmem:[%s3214_s12 + $0xe4] sm:$0xf] }
  0x72   : > { %v2231_v4 = vor.u32 %v2387_v2, %v2230_v1  ;;  %v2232_v5 = vld [vmem:[%s3214_s12 + $0xf0] sm:$0xf0]  ;;  %v2214_v6 = vld [vmem:[%s3214_s12 + $0xc0] sm:$0xf]  ;;  %v2383_v7 = vld [vmem:[%s3214_s12 + $0xcc] sm:$0xf0] }
  0x73   : > { %v2235_v8 = vor.u32 %v2385_v3, %v2232_v5  ;;  %v2381_v9 = vld [vmem:[%s3214_s12 + $0xc4] sm:$0xf]  ;;  %v2216_v10 = vld [vmem:[%s3214_s12 + $0xd0] sm:$0xf0]  ;;  %v2215_v11 = vor.u32 %v2383_v7, %v2214_v6  ;;  %v2198_v13 = vld [vmem:[%s3214_s12 + $0xa0] sm:$0xf] }
  0x74   : > { %2453 = vmatpush.bf16.msra.mxu2 %v2231_v4  ;;  %666 = vmatpush.bf16.msra.mxu0 %v2231_v4  ;;  %v2219_v12 = vor.u32 %v2381_v9, %v2216_v10  ;;  %v2379_v14 = vld [vmem:[%s3214_s12 + $0xac] sm:$0xf0]  ;;  %v2377_v15 = vld [vmem:[%s3214_s12 + $0xa4] sm:$0xf]  ;;  %v2200_v16 = vld [vmem:[%s3214_s12 + $0xb0] sm:$0xf0] }
  0x75   : > { %2461 = vmatpush.bf16.msra.mxu3 %v2235_v8  ;;  %715 = vmatpush.bf16.msra.mxu1 %v2235_v8  ;;  %v2199_v17 = vor.u32 %v2379_v14, %v2198_v13  ;;  %v2203_v18 = vor.u32 %v2377_v15, %v2200_v16  ;;  %v2182_v19 = vld [vmem:[%s3214_s12 + $0x80] sm:$0xf]  ;;  %v2375_v20 = vld [vmem:[%s3214_s12 + $0x8c] sm:$0xf0]  ;;  %v2373_v21 = vld [vmem:[%s3214_s12 + $0x84] sm:$0xf] }
  0x76   : > { %v2184_v22 = vld [vmem:[%s3214_s12 + $0x90] sm:$0xf0]  ;;  %v2183_v23 = vor.u32 %v2375_v20, %v2182_v19  ;;  %v2166_v25 = vld [vmem:[%s3214_s12 + $0x60] sm:$0xf]  ;;  %v2371_v26 = vld [vmem:[%s3214_s12 + $0x6c] sm:$0xf0] }
  0x77   : > { %v2187_v24 = vor.u32 %v2373_v21, %v2184_v22  ;;  %v2369_v27 = vld [vmem:[%s3214_s12 + $0x64] sm:$0xf]  ;;  %v2168_v28 = vld [vmem:[%s3214_s12 + $0x70] sm:$0xf0]  ;;  %v2167_v29 = vor.u32 %v2371_v26, %v2166_v25  ;;  %v2150_v31 = vld [vmem:[%s3214_s12 + $0x40] sm:$0xf] }
  0x78   : > { %2454 = vmatpush.bf16.msra.mxu2 %v2215_v11  ;;  %667 = vmatpush.bf16.msra.mxu0 %v2215_v11  ;;  %v2171_v30 = vor.u32 %v2369_v27, %v2168_v28  ;;  %v2367_v32 = vld [vmem:[%s3214_s12 + $0x4c] sm:$0xf0]  ;;  %v2365_v33 = vld [vmem:[%s3214_s12 + $0x44] sm:$0xf]  ;;  %v2152_v34 = vld [vmem:[%s3214_s12 + $0x50] sm:$0xf0] }
  0x79   : > { %2462 = vmatpush.bf16.msra.mxu3 %v2219_v12  ;;  %716 = vmatpush.bf16.msra.mxu1 %v2219_v12  ;;  %v2151_v35 = vor.u32 %v2367_v32, %v2150_v31  ;;  %v2155_v36 = vor.u32 %v2365_v33, %v2152_v34  ;;  %v2134_v37 = vld [vmem:[%s3214_s12 + $0x20] sm:$0xf]  ;;  %v2363_v38 = vld [vmem:[%s3214_s12 + $0x2c] sm:$0xf0]  ;;  %v2361_v39 = vld [vmem:[%s3214_s12 + $0x24] sm:$0xf] }
  0x7a   : > { %v2136_v40 = vld [vmem:[%s3214_s12 + $0x30] sm:$0xf0]  ;;  %v2135_v41 = vor.u32 %v2363_v38, %v2134_v37  ;;  %v2118_v43 = vld [vmem:[%s3214_s12] sm:$0xf]  ;;  %v2359_v44 = vld [vmem:[%s3214_s12 + $0xc] sm:$0xf0] }
  0x7b   : > { %v2139_v42 = vor.u32 %v2361_v39, %v2136_v40  ;;  %v2357_v45 = vld [vmem:[%s3214_s12 + $0x4] sm:$0xf]  ;;  %v2120_v46 = vld [vmem:[%s3214_s12 + $0x10] sm:$0xf0]  ;;  %v2238_v47 = vld [vmem:[%s3214_s12 + $0xe8] sm:$0xf]  ;;  %v2119_v51 = vor.u32 %v2359_v44, %v2118_v43 }
  0x7c   : > { %2455 = vmatpush.bf16.msra.mxu2 %v2199_v17  ;;  %668 = vmatpush.bf16.msra.mxu0 %v2199_v17  ;;  %v2388_v48 = vld [vmem:[%s3214_s12 + $0xf4] sm:$0xf0]  ;;  %v2386_v49 = vld [vmem:[%s3214_s12 + $0xec] sm:$0xf]  ;;  %v2240_v50 = vld [vmem:[%s3214_s12 + $0xf8] sm:$0xf0]  ;;  %v2123_v52 = vor.u32 %v2357_v45, %v2120_v46 }
  0x7d   : > { %2463 = vmatpush.bf16.msra.mxu3 %v2203_v18  ;;  %717 = vmatpush.bf16.msra.mxu1 %v2203_v18  ;;  %v2239_v53 = vor.u32 %v2388_v48, %v2238_v47  ;;  %v3268_v54 = vld [vmem:[%s3206_s0 + $0x20] sm:$0xff]  ;;  %v2243_v55 = vor.u32 %v2386_v49, %v2240_v50  ;;  %v2222_v56 = vld [vmem:[%s3214_s12 + $0xc8] sm:$0xf]  ;;  %v2384_v57 = vld [vmem:[%s3214_s12 + $0xd4] sm:$0xf0]  ;;  %s4918_s8 = sld [smem:[#allocation19_spill]] }
  0x7e   : > { %v3273_v58 = vld [vmem:[%s3206_s0] sm:$0xff]  ;;  %v2382_v59 = vld [vmem:[%s3214_s12 + $0xcc] sm:$0xf]  ;;  %v2224_v60 = vld [vmem:[%s3214_s12 + $0xd8] sm:$0xf0]  ;;  %v2223_v61 = vor.u32 %v2384_v57, %v2222_v56 }
  0x7f   : > { %v2227_v62 = vor.u32 %v2382_v59, %v2224_v60  ;;  %v2206_v63 = vld [vmem:[%s3214_s12 + $0xa8] sm:$0xf]  ;;  %v2380_v0 = vld [vmem:[%s3214_s12 + $0xb4] sm:$0xf0]  ;;  %v2378_v1 = vld [vmem:[%s3214_s12 + $0xac] sm:$0xf] }
  0x80   : > { %2456 = vmatpush.bf16.msra.mxu2 %v2183_v23  ;;  %669 = vmatpush.bf16.msra.mxu0 %v2183_v23  ;;  %v2208_v2 = vld [vmem:[%s3214_s12 + $0xb8] sm:$0xf0]  ;;  %v2207_v3 = vor.u32 %v2380_v0, %v2206_v63  ;;  %v2190_v5 = vld [vmem:[%s3214_s12 + $0x88] sm:$0xf]  ;;  %v2376_v6 = vld [vmem:[%s3214_s12 + $0x94] sm:$0xf0] }
  0x81   : > { %2464 = vmatpush.bf16.msra.mxu3 %v2187_v24  ;;  %718 = vmatpush.bf16.msra.mxu1 %v2187_v24  ;;  %v2211_v4 = vor.u32 %v2378_v1, %v2208_v2  ;;  %v2374_v7 = vld [vmem:[%s3214_s12 + $0x8c] sm:$0xf]  ;;  %v2192_v8 = vld [vmem:[%s3214_s12 + $0x98] sm:$0xf0]  ;;  %v2191_v9 = vor.u32 %v2376_v6, %v2190_v5  ;;  %v2174_v11 = vld [vmem:[%s3214_s12 + $0x68] sm:$0xf] }
  0x82   : > { %v2195_v10 = vor.u32 %v2374_v7, %v2192_v8  ;;  %v2372_v12 = vld [vmem:[%s3214_s12 + $0x74] sm:$0xf0]  ;;  %v2370_v13 = vld [vmem:[%s3214_s12 + $0x6c] sm:$0xf]  ;;  %v2176_v14 = vld [vmem:[%s3214_s12 + $0x78] sm:$0xf0] }
  0x83   : > { %v2175_v15 = vor.u32 %v2372_v12, %v2174_v11  ;;  %v2354_v16 = vld [vmem:[%s3206_s0 + $0x28] sm:$0xff]  ;;  %v2179_v17 = vor.u32 %v2370_v13, %v2176_v14  ;;  %v2368_v19 = vld [vmem:[%s3214_s12 + $0x54] sm:$0xf0]  ;;  %v2160_v22 = vld [vmem:[%s3214_s12 + $0x58] sm:$0xf0]  ;;  %p2340_p7 = scmp.ne.s32.totalorder %s4918_s8, 1 }
  0x84   : > { %2457 = vmatpush.bf16.msra.mxu2 %v2167_v29  ;;  %670 = vmatpush.bf16.msra.mxu0 %v2167_v29  ;;  %v2158_v18 = vld [vmem:[%s3214_s12 + $0x48] sm:$0xf]  ;;  %v2366_v21 = vld [vmem:[%s3214_s12 + $0x4c] sm:$0xf]  ;;  %v2364_v26 = vld [vmem:[%s3214_s12 + $0x34] sm:$0xf0] }
  0x85   : > { %2465 = vmatpush.bf16.msra.mxu3 %v2171_v30  ;;  %719 = vmatpush.bf16.msra.mxu1 %v2171_v30  ;;  %v2350_v20 = vld [vmem:[%s3206_s0 + $0x8] sm:$0xff]  ;;  %v2159_v23 = vor.u32 %v2368_v19, %v2158_v18  ;;  %v2163_v24 = vor.u32 %v2366_v21, %v2160_v22  ;;  %v2144_v29 = vld [vmem:[%s3214_s12 + $0x38] sm:$0xf0]  ;;  %v2360_v32 = vld [vmem:[%s3214_s12 + $0x14] sm:$0xf0]  ;;  %s4919_s24 = sld [smem:[#allocation51_spill]] (!%p2340_p7) }
  0x86   : > { %v2142_v25 = vld [vmem:[%s3214_s12 + $0x28] sm:$0xf]  ;;  %v2362_v27 = vld [vmem:[%s3214_s12 + $0x2c] sm:$0xf]  ;;  %v2128_v34 = vld [vmem:[%s3214_s12 + $0x18] sm:$0xf0] }
  0x87   : > { %v2143_v28 = vor.u32 %v2364_v26, %v2142_v25  ;;  %v2147_v30 = vor.u32 %v2362_v27, %v2144_v29  ;;  %v2126_v31 = vld [vmem:[%s3214_s12 + $0x8] sm:$0xf]  ;;  %v2358_v33 = vld [vmem:[%s3214_s12 + $0xc] sm:$0xf]  ;;  %v2355_v37 = vld [vmem:[%s3206_s0 + $0x30] sm:$0xff] }
  0x88   : > { %2458 = vmatpush.bf16.msra.mxu2 %v2151_v35  ;;  %671 = vmatpush.bf16.msra.mxu0 %v2151_v35  ;;  %v2127_v35 = vor.u32 %v2360_v32, %v2126_v31  ;;  %v2351_v38 = vld [vmem:[%s3206_s0 + $0x10] sm:$0xff]  ;;  %v2356_v39 = vld [vmem:[%s3206_s0 + $0x38] sm:$0xff]  ;;  %v2396_v43 = vld [vmem:[%s3222_s15 + $0x38] sm:$0xff] }
  0x89   : > { %2466 = vmatpush.bf16.msra.mxu3 %v2155_v36  ;;  %720 = vmatpush.bf16.msra.mxu1 %v2155_v36  ;;  %v2131_v36 = vor.u32 %v2358_v33, %v2128_v34  ;;  %v2352_v40 = vld [vmem:[%s3206_s0 + $0x18] sm:$0xff]  ;;  %v2404_v44 = vld [vmem:[%s3222_s15 + $0x78] sm:$0xff]  ;;  %v2402_v5 = vld [vmem:[%s3222_s15 + $0x68] sm:$0xff] }
  0x8a   : > { %v3320_v47 = vld [vmem:[%s3220_s25] sm:$0xf]  ;;  %v2395_v50 = vld [vmem:[%s3222_s15 + $0x30] sm:$0xff]  ;;  %v2401_v29 = vld [vmem:[%s3222_s15 + $0x60] sm:$0xff] }
  0x8c   : > { %2459 = vmatpush.bf16.msra.mxu2 %v2135_v41  ;;  %672 = vmatpush.bf16.msra.mxu0 %v2135_v41 }
  0x8d   : > { %2467 = vmatpush.bf16.msra.mxu3 %v2139_v42  ;;  %721 = vmatpush.bf16.msra.mxu1 %v2139_v42 }
  0x90   : > { %2460 = vmatpush.bf16.msra.mxu2 %v2119_v51  ;;  %673 = vmatpush.bf16.msra.mxu0 %v2119_v51  ;;  %v2403_v51 = vld [vmem:[%s3222_s15 + $0x70] sm:$0xff] }
  0x91   : > { %2468 = vmatpush.bf16.msra.mxu3 %v2123_v52  ;;  %722 = vmatpush.bf16.msra.mxu1 %v2123_v52  ;;  %v3325_v52 = vperm.slane %v3320_v47, 0 }
  0x93   : > { %694 = vmatmul.bf16.vlgmr.msra.gmra.mxu2 %v3268_v54  ;;  %674 = vmatmul.bf16.vlgmr.msra.gmra.mxu0 %v3273_v58 }
  0x94   : > { %764 = vmatpush.bf16.msrb.mxu2 %v2239_v53  ;;  %743 = vmatmul.bf16.vlgmr.msra.gmra.mxu3 %v3268_v54  ;;  %v3328_v53 = vperm.slane %v3320_v47, 1 }
  0x95   : > { %813 = vmatpush.bf16.msrb.mxu3 %v2243_v55  ;;  %723 = vmatmul.bf16.vlgmr.msra.gmra.mxu1 %v3273_v58 }
  0x96   : > { %1694 = vmatpush.bf16.msrb.mxu0 %v2396_v43  ;;  %1743 = vmatpush.bf16.msrb.mxu1 %v2404_v44 }
  0x98   : > { %765 = vmatpush.bf16.msrb.mxu2 %v2223_v61 }
  0x99   : > { %814 = vmatpush.bf16.msrb.mxu3 %v2227_v62 }
  0x9a   : > { %1695 = vmatpush.bf16.msrb.mxu0 %v2395_v50  ;;  %1744 = vmatpush.bf16.msrb.mxu1 %v2403_v51 }
  0x9c   : > { %766 = vmatpush.bf16.msrb.mxu2 %v2207_v3  ;;  %v2394_v3 = vld [vmem:[%s3222_s15 + $0x28] sm:$0xff] }
  0x9d   : > { %815 = vmatpush.bf16.msrb.mxu3 %v2211_v4 }
  0x9e   : > { %1696 = vmatpush.bf16.msrb.mxu0 %v2394_v3  ;;  %1745 = vmatpush.bf16.msrb.mxu1 %v2402_v5 }
  0xa0   : > { %767 = vmatpush.bf16.msrb.mxu2 %v2191_v9 }
  0xa1   : > { %816 = vmatpush.bf16.msrb.mxu3 %v2195_v10 }
  0xa2   : > { %1746 = vmatpush.bf16.msrb.mxu1 %v2401_v29 }
  0xa3   : > { %699 = vmatmul.bf16.gmra.mxu2 %v2354_v16  ;;  %679 = vmatmul.bf16.gmra.mxu0 %v2350_v20 }
  0xa4   : > { %768 = vmatpush.bf16.msrb.mxu2 %v2175_v15  ;;  %748 = vmatmul.bf16.gmra.mxu3 %v2354_v16 }
  0xa5   : > { %817 = vmatpush.bf16.msrb.mxu3 %v2179_v17  ;;  %728 = vmatmul.bf16.gmra.mxu1 %v2350_v20 }
  0xa8   : > { %769 = vmatpush.bf16.msrb.mxu2 %v2159_v23 }
  0xa9   : > { %818 = vmatpush.bf16.msrb.mxu3 %v2163_v24 }
  0xac   : > { %770 = vmatpush.bf16.msrb.mxu2 %v2143_v28  ;;  %v2393_v28 = vld [vmem:[%s3222_s15 + $0x20] sm:$0xff] }
  0xad   : > { %819 = vmatpush.bf16.msrb.mxu3 %v2147_v30  ;;  %1697 = vmatpush.bf16.msrb.mxu0 %v2393_v28  ;;  %v2400_v28 = vld [vmem:[%s3222_s15 + $0x58] sm:$0xff] }
  0xae   : > { %1747 = vmatpush.bf16.msrb.mxu1 %v2400_v28 }
  0xb0   : > { %771 = vmatpush.bf16.msrb.mxu2 %v2127_v35 }
  0xb1   : > { %820 = vmatpush.bf16.msrb.mxu3 %v2131_v36 }
  0xb3   : > { %704 = vmatmul.bf16.gmra.mxu2 %v2355_v37  ;;  %684 = vmatmul.bf16.gmra.mxu0 %v2351_v38 }
  0xb4   : > { %753 = vmatmul.bf16.gmra.mxu3 %v2355_v37 }
  0xb5   : > { %733 = vmatmul.bf16.gmra.mxu1 %v2351_v38 }
  0xc3   : > { %709 = vmatmul.bf16.gmra.mxu2 %v2356_v39  ;;  %689 = vmatmul.bf16.gmra.mxu0 %v2352_v40 }
  0xc4   : > { %758 = vmatmul.bf16.gmra.mxu3 %v2356_v39 }
  0xc5   : > { %738 = vmatmul.bf16.gmra.mxu1 %v2352_v40 }
  0xd3   : > { %772 = vmatmul.bf16.vlgmr.msrb.gmra.mxu2 %v3273_v58 }
  0xd4   : > { %821 = vmatmul.bf16.vlgmr.msrb.gmra.mxu3 %v3273_v58 }
  0xe3   : > { %777 = vmatmul.bf16.gmra.mxu2 %v2350_v20 }
  0xe4   : > { %826 = vmatmul.bf16.gmra.mxu3 %v2350_v20 }
  0xf3   : > { %782 = vmatmul.bf16.gmra.mxu2 %v2351_v38 }
  0xf4   : > { %831 = vmatmul.bf16.gmra.mxu3 %v2351_v38 }
 0x103   : > { %787 = vmatmul.bf16.gmra.mxu2 %v2352_v40 }
 0x104   : > { %836 = vmatmul.bf16.gmra.mxu3 %v2352_v40 }
 0x110   : > { %v675_v48 = vpop.f32.mrf.mxu0 }
 0x112   : > { %v724_v49 = vpop.f32.mrf.mxu1 }
 0x113   : > { %792 = vmatmul.bf16.gmra.mxu2 %v3268_v54  ;;  %v3334_v55 = vadd.f32 %v724_v49, %v3328_v53 }
 0x114   : > { %841 = vmatmul.bf16.gmra.mxu3 %v3268_v54  ;;  %v3331_v54 = vadd.f32 %v675_v48, %v3325_v52 }
 0x115   : > { %v2245_v59 = vmul.f32 -1.442695, %v3334_v55 }
 0x116   : > { %v695_v41 = vpop.f32.mrf.mxu2  ;;  %v2244_v56 = vmul.f32 -1.442695, %v3331_v54 }
 0x117   : > { %v744_v42 = vpop.f32.mrf.mxu3  ;;  %v3343_v60 = vadd.f32 %v695_v41, %v3325_v52 }
 0x118   : > { %v677_v61 = vpop.f32.mrf.mxu0  ;;  %2593 = vpow2.f32 %v2244_v56  ;;  %v3346_v63 = vadd.f32 %v744_v42, %v3328_v53 }
 0x119   : > { %2595 = vpow2.f32 %v2245_v59  ;;  %v2260_v0 = vmul.f32 -1.442695, %v3343_v60  ;;  %v3350_v1 = vadd.f32 %v677_v61, %v3325_v52 }
 0x11a   : > { %v726_v62 = vpop.f32.mrf.mxu1  ;;  %v2261_v4 = vmul.f32 -1.442695, %v3346_v63 }
 0x11b   : > { %v3353_v2 = vadd.f32 %v726_v62, %v3328_v53  ;;  %2597 = vpow2.f32 %v2260_v0  ;;  %v2246_v6 = vmul.f32 -1.442695, %v3350_v1 }
 0x11c   : > { %2599 = vpow2.f32 %v2261_v4 }
 0x11d   : > { %v2247_v8 = vmul.f32 -1.442695, %v3353_v2  ;;  %2601 = vpow2.f32 %v2246_v6 }
 0x11e   : > { %v697_v45 = vpop.f32.mrf.mxu2  ;;  %v2594_v7 = vpop.eup %2593 }
 0x11f   : > { %v3317_v46 = vpop.f32.mrf.mxu3  ;;  %v2596_v11 = vpop.eup %2595  ;;  %v3365_v12 = vadd.f32 %v697_v45, %v3325_v52  ;;  %v3367_v13 = vadd.f32 1.0, %v2594_v7  ;;  %2603 = vpow2.f32 %v2247_v8 }
 0x120   : > { %v3369_v14 = vadd.f32 1.0, %v2596_v11  ;;  %v680_v25 = vpop.f32.mrf.mxu0  ;;  %v3396_v32 = vadd.f32 %v3317_v46, %v3328_v53 }
 0x121   : > { %v2598_v15 = vpop.eup %2597  ;;  %2605 = vrcp.f32 %v3367_v13  ;;  %v1001_v35 = vand.u32 2147483648, %v3367_v13  ;;  %v3411_v40 = vadd.f32 %v680_v25, %v3325_v52  ;;  %vm995_vm0 = vweird.f32 %v3367_v13  ;;  %v2392_v25 = vld [vmem:[%s3222_s15 + $0x18] sm:$0xff] }
 0x122   : > { %v2600_v17 = vpop.eup %2599  ;;  %2607 = vrcp.f32 %v3369_v14  ;;  %v3374_v18 = vadd.f32 1.0, %v2598_v15  ;;  %v729_v34 = vpop.f32.mrf.mxu1  ;;  %v1016_v38 = vand.u32 2147483648, %v3369_v14  ;;  %v2263_v41 = vmul.f32 -1.442695, %v3396_v32  ;;  %1698 = vmatpush.bf16.msrb.mxu0 %v2392_v25 }
 0x123   : > { %797 = vmatmul.bf16.gmra.mxu2 %v2354_v16  ;;  %v2602_v19 = vpop.eup %2601  ;;  %v3380_v23 = vadd.f32 1.0, %v2600_v17  ;;  %v3415_v42 = vadd.f32 %v729_v34, %v3328_v53  ;;  %v999_v44 = vand.u32 2147483647, %v3367_v13  ;;  %v3426_v50 = vor.u32 1.1754944e-38, %v1001_v35 }
 0x124   : > { %846 = vmatmul.bf16.gmra.mxu3 %v2354_v16  ;;  %v2262_v16 = vmul.f32 -1.442695, %v3365_v12  ;;  %v3383_v24 = vadd.f32 1.0, %v2602_v19  ;;  %v1241_v45 = vand.u32 2147483648, %v3374_v18  ;;  %vm1010_vm1 = vweird.f32 %v3369_v14 }
 0x125   : > { %v2604_v20 = vpop.eup %2603  ;;  %v1014_v61 = vand.u32 2147483647, %v3369_v14  ;;  %v3434_v62 = vor.u32 1.1754944e-38, %v1016_v38  ;;  %v2248_v0 = vmul.f32 -1.442695, %v3411_v40  ;;  %v1256_v15 = vand.u32 2147483648, %v3380_v23 }
 0x126   : > { %v3337_v57 = vpop.f32.mrf.mxu2  ;;  %2609 = vpow2.f32 %v2262_v16  ;;  %v3387_v27 = vadd.f32 1.0, %v2604_v20  ;;  %v1239_v5 = vand.u32 2147483647, %v3374_v18  ;;  %v2249_v6 = vmul.f32 -1.442695, %v3415_v42 }
 0x127   : > { %v3339_v58 = vpop.f32.mrf.mxu3  ;;  %2611 = vrcp.f32 %v3374_v18  ;;  %v3385_v26 = vpop.eup %2605  ;;  %v3444_v7 = vadd.f32 %v3337_v57, %v3325_v52  ;;  %v3448_v11 = vor.u32 1.1754944e-38, %v1241_v45  ;;  %vm3451_vm3 = vcmp.eq.f32.partialorder %v999_v44, 8.507059e+37 }
 0x128   : > { %v3391_v30 = vpop.eup %2607  ;;  %2613 = vrcp.f32 %v3380_v23  ;;  %v991_v33 = vmul.f32 %v3385_v26, %v3367_v13  ;;  %v682_v3 = vpop.f32.mrf.mxu0  ;;  %vm996_vm2 = vweird.f32 %v3385_v26  ;;  %vm3463_vm4 = vcmp.eq.f32.partialorder %v1014_v61, 8.507059e+37 }
 0x129   : > { %2615 = vrcp.f32 %v3383_v24  ;;  %v1006_v36 = vmul.f32 %v3391_v30, %v3369_v14  ;;  %4761 = vst [vmem:[#allocation28_spill] sm:$0xff] %v3444_v7  ;;  %v3459_v57 = vadd.f32 %v682_v3, %v3325_v52  ;;  %v3473_v34 = vadd.f32 %v3339_v58, %v3328_v53  ;;  %vm3490_vm8 = vmor %vm995_vm0, %vm996_vm2 }
 0x12a   : > { %2617 = vrcp.f32 %v3387_v27  ;;  %v992_v43 = vsub.f32 1.0, %v991_v33  ;;  %v731_v35 = vpop.f32.mrf.mxu1  ;;  %vm1011_vm5 = vweird.f32 %v3391_v30  ;;  %v2264_v38 = vmul.f32 -1.442695, %v3444_v7 }
 0x12b   : > { %v1007_v51 = vsub.f32 1.0, %v1006_v36  ;;  %4766 = vst [vmem:[#allocation29_spill] sm:$0xff] %v3473_v34  ;;  %v1254_v36 = vand.u32 2147483647, %v3380_v23  ;;  %vm1235_vm6 = vweird.f32 %v3374_v18  ;;  %v3482_v44 = vor.u32 1.1754944e-38, %v1256_v15  ;;  %vm3503_vm9 = vmor %vm1010_vm1, %vm1011_vm5 }
 0x12c   : > { %v2610_v31 = vpop.eup %2609  ;;  %v993_v8 = vmul.f32 %v3385_v26, %v992_v43  ;;  %vm1025_vm7 = vweird.f32 %v3383_v24  ;;  %v1029_v58 = vand.u32 2147483647, %v3383_v24  ;;  %v3497_v3 = vadd.f32 %v731_v35, %v3328_v53 }
 0x12d   : > { %v1008_v17 = vmul.f32 %v3391_v30, %v1007_v51  ;;  %v1031_v28 = vand.u32 2147483648, %v3383_v24  ;;  %vm1040_vm10 = vweird.f32 %v3387_v27  ;;  %vm3521_vm12 = vcmp.eq.f32.partialorder %v1239_v5, 8.507059e+37 }
 0x12e   : > { %v3360_v9 = vpop.f32.mrf.mxu2  ;;  %v994_v43 = vadd.f32 %v3385_v26, %v993_v8  ;;  %vm1250_vm13 = vweird.f32 %v3380_v23  ;;  %vm3544_vm15 = vcmp.eq.f32.partialorder %v1254_v36, 8.507059e+37 }
 0x12f   : > { %v3362_v10 = vpop.f32.mrf.mxu3 }
 0x133   : > { %802 = vmatmul.bf16.gmra.mxu2 %v2355_v37 }
 0x134   : > { %851 = vmatmul.bf16.gmra.mxu3 %v2355_v37  ;;  %v3405_v37 = vpop.eup %2611 }
 0x135   : > { %v3424_v49 = vpop.eup %2613  ;;  %v1231_v56 = vmul.f32 %v3405_v37, %v3374_v18  ;;  %vm1236_vm11 = vweird.f32 %v3405_v37 }
 0x136   : > { %v3376_v21 = vpop.f32.mrf.mxu2  ;;  %v3431_v59 = vpop.eup %2615  ;;  %v1246_v20 = vmul.f32 %v3424_v49, %v3380_v23  ;;  %vm3559_vm1 = vmor %vm1235_vm6, %vm1236_vm11  ;;  %vm1251_vm2 = vweird.f32 %v3424_v49 }
 0x137   : > { %v3378_v22 = vpop.f32.mrf.mxu3  ;;  %v3438_v4 = vpop.eup %2617  ;;  %v1232_v19 = vsub.f32 1.0, %v1231_v56  ;;  %v1009_v56 = vadd.f32 %v3391_v30, %v1008_v17  ;;  %v2265_v17 = vmul.f32 -1.442695, %v3473_v34  ;;  %vm1026_vm14 = vweird.f32 %v3431_v59 }
 0x138   : > { %v1036_v33 = vmul.f32 %v3438_v4, %v3387_v27  ;;  %v1247_v61 = vsub.f32 1.0, %v1246_v20  ;;  %vm1041_vm0 = vweird.f32 %v3438_v4 }
 0x139   : > { %v1233_v13 = vmul.f32 %v3405_v37, %v1232_v19  ;;  %v998_v19 = vsel %vm3490_vm8, %v3385_v26, %v994_v43  ;;  %v2251_v26 = vmul.f32 -1.442695, %v3497_v3  ;;  %vm3589_vm5 = vmor %vm1040_vm10, %vm1041_vm0 }
 0x13a   : > { %v1037_v15 = vsub.f32 1.0, %v1036_v33  ;;  %v1044_v33 = vand.u32 2147483647, %v3387_v27  ;;  %v1248_v51 = vmul.f32 %v3424_v49, %v1247_v61 }
 0x13b   : > { %v1234_v5 = vadd.f32 %v3405_v37, %v1233_v13 }
 0x13c   : > { %vm3595_vm6 = vcmp.eq.f32.partialorder %v1044_v33, 8.507059e+37 }
 0x13e   : > { %v3420_v46 = vpop.f32.mrf.mxu2 }
 0x13f   : > { %v3422_v48 = vpop.f32.mrf.mxu3 }
 0x140   : > { %4760 = vst [vmem:[#allocation27_spill] sm:$0xff] %v3422_v48 }
 0x143   : > { %807 = vmatmul.bf16.gmra.mxu2 %v2356_v39 }
 0x144   : > { %856 = vmatmul.bf16.gmra.mxu3 %v2356_v39  ;;  %v3408_v39 = vadd.f32 1.0, %v2610_v31  ;;  %v1021_v31 = vmul.f32 %v3431_v59, %v3383_v24 }
 0x146   : > { %2619 = vrcp.f32 %v3408_v39  ;;  %v1022_v8 = vsub.f32 1.0, %v1021_v31  ;;  %v3509_v20 = vpop.f32.mrf.mxu2  ;;  %vm1265_vm8 = vweird.f32 %v3408_v39  ;;  %v1269_v33 = vand.u32 2147483647, %v3408_v39 }
 0x147   : > { %2621 = vpow2.f32 %v2263_v41  ;;  %4771 = vst [vmem:[#allocation30_spill] sm:$0xff] %v3509_v20  ;;  %v3511_v25 = vpop.f32.mrf.mxu3 }
 0x148   : > { %2623 = vpow2.f32 %v2248_v0  ;;  %v2250_v0 = vmul.f32 -1.442695, %v3459_v57  ;;  %4772 = vst [vmem:[#allocation31_spill] sm:$0xff] %v3511_v25  ;;  %v1023_v43 = vmul.f32 %v3431_v59, %v1022_v8  ;;  %v1038_v25 = vmul.f32 %v3438_v4, %v1037_v15  ;;  %v685_v15 = vpop.f32.mrf.mxu0 }
 0x149   : > { %2625 = vpow2.f32 %v2249_v6  ;;  %v1032_v8 = vor.u32 1.1754944e-38, %v1031_v28  ;;  %vm3663_vm10 = vcmp.eq.f32.partialorder %v1269_v33, 8.507059e+37 }
 0x14a   : > { %2627 = vpow2.f32 %v2264_v38  ;;  %v1013_v38 = vsel %vm3503_vm9, %v3391_v30, %v1009_v56  ;;  %v1003_v30 = vsel %vm3451_vm3, %v3426_v50, %v998_v19  ;;  %vm3564_vm3 = vcmp.eq.f32.partialorder %v1029_v58, 8.507059e+37 }
 0x14b   : > { %2629 = vpow2.f32 %v2250_v0  ;;  %v1018_v6 = vsel %vm3463_vm4, %v3434_v62, %v1013_v38  ;;  %v1249_v62 = vadd.f32 %v3424_v49, %v1248_v51  ;;  %v1024_v29 = vadd.f32 %v3431_v59, %v1023_v43  ;;  %vm3577_vm4 = vmor %vm1025_vm7, %vm1026_vm14  ;;  %v734_v51 = vpop.f32.mrf.mxu1 }
 0x14c   : > { %v3478_v41 = vpop.eup %2619  ;;  %2631 = vpow2.f32 %v2265_v17  ;;  %v1039_v36 = vadd.f32 %v3438_v4, %v1038_v25  ;;  %v3583_v13 = vmul.f32 %v1003_v30, %v3331_v54  ;;  %vm3616_vm7 = vmor %vm1250_vm13, %vm1251_vm2 }
 0x14d   : > { %v2622_v45 = vpop.eup %2621  ;;  %v1261_v14 = vmul.f32 %v3478_v41, %v3408_v39  ;;  %v1253_v31 = vsel %vm3616_vm7, %v3424_v49, %v1249_v62  ;;  %vm1266_vm9 = vweird.f32 %v3478_v41  ;;  %v3641_v49 = vadd.f32 %v3360_v9, %v3325_v52 }
 0x14e   : > { %v2624_v35 = vpop.eup %2623  ;;  %v3527_v34 = vadd.f32 1.0, %v2622_v45  ;;  %v1046_v45 = vand.u32 2147483648, %v3387_v27  ;;  %v3602_v27 = vpop.f32.mrf.mxu2  ;;  %v1043_v23 = vsel %vm3589_vm5, %v3438_v4, %v1039_v36  ;;  %v1271_v4 = vand.u32 2147483648, %v3408_v39  ;;  %vm3673_vm11 = vmor %vm1265_vm8, %vm1266_vm9 }
 0x14f   : > { %v2626_v7 = vpop.eup %2625  ;;  %v1262_v20 = vsub.f32 1.0, %v1261_v14  ;;  %v3539_v48 = vadd.f32 1.0, %v2624_v35  ;;  %4787 = vst [vmem:[#allocation32_spill] sm:$0xff] %v3602_v27  ;;  %v3604_v14 = vpop.f32.mrf.mxu3  ;;  %v3607_v35 = vmul.f32 %v1018_v6, %v3334_v55  ;;  %v1258_v9 = vsel %vm3544_vm15, %v3482_v44, %v1253_v31 }
 0x150   : > { %2633 = vrcp.f32 %v3527_v34  ;;  %v3550_v61 = vadd.f32 1.0, %v2626_v7  ;;  %v2628_v0 = vpop.eup %2627  ;;  %v1238_v7 = vsel %vm3559_vm1, %v3405_v37, %v1234_v5  ;;  %v1047_v54 = vor.u32 1.1754944e-38, %v1046_v45  ;;  %4788 = vst [vmem:[#allocation33_spill] sm:$0xff] %v3604_v14  ;;  %v2391_v45 = vld [vmem:[%s3222_s15 + $0x10] sm:$0xff] }
 0x151   : > { %2635 = vpow2.f32 %v2251_v26  ;;  %v2630_v58 = vpop.eup %2629  ;;  %v1263_v24 = vmul.f32 %v3478_v41, %v1262_v20  ;;  %v3600_v28 = vadd.f32 1.0, %v2628_v0  ;;  %4789 = vst [vmem:[#allocation34_spill] sm:$0xff] %v3607_v35  ;;  %v1243_v20 = vsel %vm3521_vm12, %v3448_v11, %v1238_v7  ;;  %1699 = vmatpush.bf16.msrb.mxu0 %v2391_v45 }
 0x152   : > { %2637 = vrcp.f32 %v3539_v48  ;;  %v2632_v17 = vpop.eup %2631  ;;  %v1028_v11 = vsel %vm3577_vm4, %v3431_v59, %v1024_v29  ;;  %v3633_v38 = vadd.f32 1.0, %v2630_v58  ;;  %4792 = vst [vmem:[#allocation35_spill] sm:$0xff] %v3641_v49  ;;  %v2399_v59 = vld [vmem:[%s3222_s15 + $0x50] sm:$0xff]  ;;  %v3646_v30 = vmul.f32 %v1243_v20, %v3343_v60 }
 0x153   : > { %2639 = vrcp.f32 %v3550_v61  ;;  %v1264_v5 = vadd.f32 %v3478_v41, %v1263_v24  ;;  %v3637_v43 = vadd.f32 1.0, %v2632_v17  ;;  %v3652_v0 = vadd.f32 %v3362_v10, %v3328_v53  ;;  %1748 = vmatpush.bf16.msrb.mxu1 %v2399_v59  ;;  %v736_v45 = vpop.f32.mrf.mxu1 }
 0x154   : > { %4793 = vst [vmem:[#allocation36_spill] sm:$0xff] %v3646_v30  ;;  %2641 = vrcp.f32 %v3600_v28  ;;  %v1033_v50 = vsel %vm3564_vm3, %v1032_v8, %v1028_v11  ;;  %v1048_v60 = vsel %vm3595_vm6, %v1047_v54, %v1043_v23  ;;  %v3683_v62 = vadd.f32 %v685_v15, %v3325_v52 }
 0x155   : > { %4794 = vst [vmem:[#allocation37_spill] sm:$0xff] %v3652_v0  ;;  %2643 = vrcp.f32 %v3633_v38  ;;  %v1268_v29 = vsel %vm3673_vm11, %v3478_v41, %v1264_v5  ;;  %v1286_v39 = vand.u32 2147483648, %v3527_v34  ;;  %v2266_v18 = vmul.f32 -1.442695, %v3641_v49 }
 0x156   : > { %v3622_v55 = vpop.eup %2633  ;;  %4799 = vst [vmem:[#allocation38_spill] sm:$0xff] %v3683_v62  ;;  %2645 = vrcp.f32 %v3637_v43  ;;  %v3692_v36 = vmul.f32 %v1258_v9, %v3346_v63  ;;  %v1272_v58 = vor.u32 1.1754944e-38, %v1271_v4  ;;  %v2267_v37 = vmul.f32 -1.442695, %v3652_v0  ;;  %v687_v63 = vpop.f32.mrf.mxu0 }
 0x157   : > { %v2636_v26 = vpop.eup %2635  ;;  %v1276_v56 = vmul.f32 %v3622_v55, %v3527_v34  ;;  %v3698_v24 = vmul.f32 %v1033_v50, %v3350_v1  ;;  %v3701_v41 = vmul.f32 %v1048_v60, %v3353_v2  ;;  %v3706_v17 = vadd.f32 %v734_v51, %v3328_v53  ;;  %v3714_v19 = vpop.f32.mrf.mxu2 }
 0x158   : > { %v3654_v6 = vpop.eup %2637  ;;  %v3680_v16 = vadd.f32 1.0, %v2636_v26  ;;  %4800 = vst [vmem:[#allocation39_spill] sm:$0xff] %v3692_v36  ;;  %v1273_v54 = vsel %vm3663_vm10, %v1272_v58, %v1268_v29  ;;  %v2252_v1 = vmul.f32 -1.442695, %v3683_v62  ;;  %v3716_v2 = vpop.f32.mrf.mxu3  ;;  %vm1280_vm12 = vweird.f32 %v3527_v34 }
 0x159   : > { %v3667_v10 = vpop.eup %2639  ;;  %v1051_v8 = vmul.f32 %v3654_v6, %v3539_v48  ;;  %4801 = vst [vmem:[#allocation40_spill] sm:$0xff] %v3706_v17  ;;  %v1277_v20 = vsub.f32 1.0, %v1276_v56  ;;  %v1284_v33 = vand.u32 2147483647, %v3527_v34  ;;  %v3720_v31 = vor.u32 1.1754944e-38, %v1286_v39 }
 0x15a   : > { %v1066_v15 = vmul.f32 %v3667_v10, %v3550_v61  ;;  %v3708_v25 = vpop.eup %2641  ;;  %2647 = vrcp.f32 %v3680_v16  ;;  %v1061_v11 = vand.u32 2147483648, %v3539_v48  ;;  %v1059_v26 = vand.u32 2147483647, %v3539_v48 }
 0x15b   : > { %2649 = vpow2.f32 %v2266_v18  ;;  %v3723_v23 = vpop.eup %2643  ;;  %v1052_v51 = vsub.f32 1.0, %v1051_v8  ;;  %v1076_v5 = vand.u32 2147483648, %v3550_v61  ;;  %v3730_v4 = vmul.f32 %v1273_v54, %v3365_v12  ;;  %v2398_v54 = vld [vmem:[%s3222_s15 + $0x48] sm:$0xff] }
 0x15c   : > { %2651 = vpow2.f32 %v2267_v37  ;;  %v3727_v59 = vpop.eup %2645  ;;  %v1067_v9 = vsub.f32 1.0, %v1066_v15  ;;  %v1074_v50 = vand.u32 2147483647, %v3550_v61  ;;  %v1291_v60 = vmul.f32 %v3708_v25, %v3600_v28  ;;  %v2390_v15 = vld [vmem:[%s3222_s15 + $0x8] sm:$0xff]  ;;  %1749 = vmatpush.bf16.msrb.mxu1 %v2398_v54 }
 0x15d   : > { %4802 = vst [vmem:[#allocation41_spill] sm:$0xff] %v3730_v4  ;;  %v1278_v7 = vmul.f32 %v3622_v55, %v1277_v20  ;;  %vm1055_vm13 = vweird.f32 %v3539_v48  ;;  %vm1070_vm14 = vweird.f32 %v3550_v61  ;;  %2653 = vpow2.f32 %v2252_v1  ;;  %1700 = vmatpush.bf16.msrb.mxu0 %v2390_v15 }
 0x15e   : > { %vm1281_vm15 = vweird.f32 %v3622_v55  ;;  %v3739_v44 = vor.u32 1.1754944e-38, %v1061_v11  ;;  %v1081_v12 = vmul.f32 %v3723_v23, %v3633_v38  ;;  %v3744_v56 = vadd.f32 %v687_v63, %v3325_v52  ;;  %v3788_v36 = vpop.f32.mrf.mxu0 }
 0x15f   : > { %v1053_v39 = vmul.f32 %v3654_v6, %v1052_v51  ;;  %vm3749_vm0 = vcmp.eq.f32.partialorder %v1059_v26, 8.507059e+37  ;;  %v3753_v58 = vor.u32 1.1754944e-38, %v1076_v5  ;;  %v1301_v8 = vand.u32 2147483648, %v3600_v28  ;;  %vm3794_vm6 = vmor %vm1280_vm12, %vm1281_vm15 }
 0x160   : > { %4803 = vst [vmem:[#allocation42_spill] sm:$0xff] %v3744_v56  ;;  %v3746_v29 = vpop.eup %2647  ;;  %v1306_v37 = vmul.f32 %v3727_v59, %v3637_v43  ;;  %vm3760_vm1 = vcmp.eq.f32.partialorder %v1284_v33, 8.507059e+37  ;;  %v1068_v1 = vmul.f32 %v3667_v10, %v1067_v9  ;;  %vm3765_vm2 = vcmp.eq.f32.partialorder %v1074_v50, 8.507059e+37  ;;  %v3780_v50 = vpop.f32.mrf.mxu2 }
 0x161   : > { %v2650_v20 = vpop.eup %2649  ;;  %v1292_v51 = vsub.f32 1.0, %v1291_v60  ;;  %v1316_v26 = vand.u32 2147483648, %v3637_v43  ;;  %v3771_v5 = vadd.f32 %v736_v45, %v3328_v53  ;;  %v1279_v49 = vadd.f32 %v3622_v55, %v1278_v7  ;;  %v3782_v45 = vpop.f32.mrf.mxu3 }
 0x162   : > { %v3773_v0 = vpop.eup %2651  ;;  %vm1056_vm3 = vweird.f32 %v3654_v6  ;;  %vm1295_vm4 = vweird.f32 %v3600_v28  ;;  %v1299_v33 = vand.u32 2147483647, %v3600_v28  ;;  %v2253_v9 = vmul.f32 -1.442695, %v3706_v17  ;;  %v2389_v17 = vld [vmem:[%s3222_s15] sm:$0xff] }
 0x163   : > { %vm1071_vm5 = vweird.f32 %v3667_v10  ;;  %v1082_v60 = vsub.f32 1.0, %v1081_v12  ;;  %v1096_v7 = vmul.f32 %v3746_v29, %v3680_v16  ;;  %v2254_v4 = vmul.f32 -1.442695, %v3744_v56  ;;  %v2654_v30 = vpop.eup %2653  ;;  %v2397_v56 = vld [vmem:[%s3222_s15 + $0x40] sm:$0xff]  ;;  %vm3808_vm7 = vmor %vm1055_vm13, %vm1056_vm3  ;;  %1701 = vmatpush.bf16.msrb.mxu0 %v2389_v17 }
 0x164   : > { %v1054_v54 = vadd.f32 %v3654_v6, %v1053_v39  ;;  %v3799_v14 = vor.u32 1.1754944e-38, %v1301_v8  ;;  %v1307_v12 = vsub.f32 1.0, %v1306_v37  ;;  %v1069_v34 = vadd.f32 %v3667_v10, %v1068_v1  ;;  %vm3824_vm8 = vmor %vm1070_vm14, %vm1071_vm5  ;;  %1750 = vmatpush.bf16.msrb.mxu1 %v2397_v56 }
 0x165   : > { %v1293_v35 = vmul.f32 %v3708_v25, %v1292_v51  ;;  %v3814_v39 = vor.u32 1.1754944e-38, %v1316_v26  ;;  %v2255_v8 = vmul.f32 -1.442695, %v3771_v5  ;;  %v1283_v37 = vsel %vm3794_vm6, %v3622_v55, %v1279_v49  ;;  %v3832_v51 = vpop.f32.mrf.mxu1 }
 0x166   : > { %vm1310_vm9 = vweird.f32 %v3637_v43  ;;  %vm1085_vm10 = vweird.f32 %v3633_v38  ;;  %v3830_v1 = vadd.f32 1.0, %v2650_v20  ;;  %2655 = vpow2.f32 %v2253_v9 }
 0x167   : > { %4814 = vst [vmem:[#allocation43_spill] sm:$0xff] %v3814_v39  ;;  %vm3834_vm11 = vcmp.eq.f32.partialorder %v1299_v33, 8.507059e+37  ;;  %v1083_v61 = vmul.f32 %v3723_v23, %v1082_v60  ;;  %v1097_v49 = vsub.f32 1.0, %v1096_v7  ;;  %v3839_v26 = vadd.f32 1.0, %v2654_v30 }
 0x168   : > { %2657 = vpow2.f32 %v2254_v4  ;;  %v1058_v20 = vsel %vm3808_vm7, %v3654_v6, %v1054_v54  ;;  %vm1296_vm12 = vweird.f32 %v3708_v25  ;;  %v1308_v9 = vmul.f32 %v3727_v59, %v1307_v12  ;;  %v3858_v62 = vpop.f32.mrf.mxu2 }
 0x169   : > { %v1089_v17 = vand.u32 2147483647, %v3633_v38  ;;  %v1073_v56 = vsel %vm3824_vm8, %v3667_v10, %v1069_v34  ;;  %v1294_v33 = vadd.f32 %v3708_v25, %v1293_v35  ;;  %vm1086_vm13 = vweird.f32 %v3723_v23  ;;  %v3860_v4 = vpop.f32.mrf.mxu3  ;;  %vm3867_vm15 = vmor %vm1295_vm4, %vm1296_vm12 }
 0x16a   : > { %2659 = vpow2.f32 %v2255_v8  ;;  %v1288_v30 = vsel %vm3760_vm1, %v3720_v31, %v1283_v37  ;;  %vm1311_vm14 = vweird.f32 %v3727_v59  ;;  %v1091_v6 = vand.u32 2147483648, %v3633_v38  ;;  %v692_v38 = vpop.f32.mrf.mxu0 }
 0x16b   : > { %2661 = vrcp.f32 %v3830_v1  ;;  %v1063_v35 = vsel %vm3749_vm0, %v3739_v44, %v1058_v20  ;;  %v1084_v31 = vadd.f32 %v3723_v23, %v1083_v61  ;;  %v1098_v63 = vmul.f32 %v3746_v29, %v1097_v49  ;;  %vm3884_vm0 = vmor %vm1085_vm10, %vm1086_vm13 }
 0x16c   : > { %2663 = vrcp.f32 %v3839_v26  ;;  %v2656_v60 = vpop.eup %2655  ;;  %v1078_v7 = vsel %vm3765_vm2, %v3753_v58, %v1073_v56  ;;  %v3878_v18 = vadd.f32 %v3727_v59, %v1308_v9  ;;  %vm1100_vm1 = vweird.f32 %v3680_v16  ;;  %vm3915_vm4 = vmor %vm1310_vm9, %vm1311_vm14 }
 0x16d   : > { %v1104_v44 = vand.u32 2147483647, %v3680_v16  ;;  %v1298_v58 = vsel %vm3867_vm15, %v3708_v25, %v1294_v33  ;;  %vm1101_vm2 = vweird.f32 %v3746_v29  ;;  %v1106_v11 = vand.u32 2147483648, %v3680_v16  ;;  %v741_v55 = vpop.f32.mrf.mxu1 }
 0x16e   : > { %4821 = vst [vmem:[#allocation44_spill] sm:$0xff] %v3878_v18  ;;  %v2658_v15 = vpop.eup %2657  ;;  %v3896_v54 = vadd.f32 1.0, %v3773_v0  ;;  %v3899_v12 = vmul.f32 %v1288_v30, %v3396_v32  ;;  %v3902_v34 = vmul.f32 %v1063_v35, %v3411_v40  ;;  %vm3904_vm3 = vcmp.eq.f32.partialorder %v1089_v17, 8.507059e+37  ;;  %vm3936_vm5 = vmor %vm1100_vm1, %vm1101_vm2 }
 0x16f   : > { %v1092_v37 = vor.u32 1.1754944e-38, %v1091_v6  ;;  %v3909_v48 = vmul.f32 %v1078_v7, %v3415_v42  ;;  %v1088_v32 = vsel %vm3884_vm0, %v3723_v23, %v1084_v31  ;;  %v1099_v40 = vadd.f32 %v3746_v29, %v1098_v63 }
 0x170   : > { %v2660_v25 = vpop.eup %2659  ;;  %v3923_v61 = vadd.f32 1.0, %v2656_v60  ;;  %v3930_v42 = vsel %vm3834_vm11, %v3799_v14, %v1298_v58  ;;  %vm3940_vm6 = vcmp.eq.f32.partialorder %v1104_v44, 8.507059e+37  ;;  %v3944_v9 = vadd.f32 1.0, %v2658_v15  ;;  %v3968_v31 = vpop.f32.mrf.mxu2 }
 0x171   : > { %v3925_v49 = vpop.eup %2661  ;;  %4828 = vst [vmem:[#allocation45_spill] sm:$0xff] %v3930_v42  ;;  %v3947_v17 = vadd.f32 %v692_v38, %v3325_v52  ;;  %v1107_v56 = vor.u32 1.1754944e-38, %v1106_v11  ;;  %2665 = vrcp.f32 %v3896_v54  ;;  %v3958_v33 = vadd.f32 %v3788_v36, %v3325_v52  ;;  %v3970_v63 = vpop.f32.mrf.mxu3 }
 0x172   : > { %v3949_v14 = vpop.eup %2663  ;;  %v1093_v30 = vsel %vm3904_vm3, %v1092_v37, %v1088_v32  ;;  %v3963_v35 = vadd.f32 1.0, %v2660_v25  ;;  %v3966_v10 = vperm.slane %v3320_v47, 2  ;;  %v1103_v60 = vsel %vm3936_vm5, %v3746_v29, %v1099_v40 }
 0x173   : > { %v1321_v36 = vmul.f32 %v3925_v49, %v3830_v1  ;;  %2667 = vrcp.f32 %v3923_v61  ;;  %v3979_v7 = vadd.f32 %v741_v55, %v3328_v53  ;;  %v1111_v28 = vmul.f32 %v3949_v14, %v3839_v26 }
 0x174   : > { %2669 = vrcp.f32 %v3944_v9  ;;  %v2258_v44 = vmul.f32 -1.442695, %v3947_v17  ;;  %v776_v15 = vadd.f32 %v3780_v50, %v3966_v10  ;;  %v3988_v29 = vmul.f32 %v1093_v30, %v3459_v57 }
 0x175   : > { %v2256_v11 = vmul.f32 -1.442695, %v3958_v33  ;;  %v3994_v38 = vadd.f32 %v3832_v51, %v3328_v53  ;;  %v3998_v8 = vadd.f32 %v3376_v21, %v3325_v52  ;;  %2671 = vrcp.f32 %v3963_v35 }
 0x176   : > { %v774_v50 = vadd.f32 %v3714_v19, %v3966_v10  ;;  %v4004_v57 = vperm.slane %v3320_v47, 3  ;;  %v1108_v25 = vsel %vm3940_vm6, %v1107_v56, %v1103_v60  ;;  %v1322_v32 = vsub.f32 1.0, %v1321_v36 }
 0x177   : > { %4833 = vst [vmem:[#allocation46_spill] sm:$0xff] %v3998_v8  ;;  %v4006_v37 = vpop.eup %2665  ;;  %v4012_v51 = vadd.f32 %v3378_v22, %v3328_v53  ;;  %v2259_v21 = vmul.f32 -1.442695, %v3979_v7  ;;  %v1112_v40 = vsub.f32 1.0, %v1111_v28  ;;  %2673 = vpow2.f32 %v2258_v44 }
 0x178   : > { %v1504_v20 = vmul.f32 %v3698_v24, %v776_v15  ;;  %v825_v47 = vadd.f32 %v3782_v45, %v4004_v57  ;;  %vm1115_vm7 = vweird.f32 %v3839_v26  ;;  %v1119_v23 = vand.u32 2147483647, %v3839_v26  ;;  %v4031_v60 = vpop.f32.mrf.mxu2 }
 0x179   : > { %4834 = vst [vmem:[#allocation47_spill] sm:$0xff] %v4012_v51  ;;  %v4018_v19 = vpop.eup %2667  ;;  %2675 = vpow2.f32 %v2256_v11  ;;  %v2257_v55 = vmul.f32 -1.442695, %v3994_v38  ;;  %v1336_v56 = vmul.f32 %v4006_v37, %v3896_v54  ;;  %v1121_v30 = vand.u32 2147483648, %v3839_v26  ;;  %v4033_v36 = vpop.f32.mrf.mxu3 }
 0x17a   : > { %v4023_v22 = vpop.eup %2669  ;;  %v1502_v24 = vmul.f32 %v3583_v13, %v774_v50  ;;  %v823_v45 = vadd.f32 %v3716_v2, %v4004_v57  ;;  %v1323_v28 = vmul.f32 %v3925_v49, %v1322_v32  ;;  %v2268_v44 = vmul.f32 -1.442695, %v3998_v8  ;;  %v4836_v50 = vld [vmem:[#allocation27_spill] sm:$0xff] }
 0x17b   : > { %v4039_v15 = vadd.f32 %v3420_v46, %v3325_v52  ;;  %2677 = vpow2.f32 %v2259_v21  ;;  %v4041_v11 = vpop.eup %2671  ;;  %v1113_v13 = vmul.f32 %v3949_v14, %v1112_v40  ;;  %v4046_v2 = vadd.f32 %v4836_v50, %v3328_v53  ;;  %v4838_v50 = vld [vmem:[#allocation34_spill] sm:$0xff] }
 0x17c   : > { %v1505_v6 = vmul.f32 %v3701_v41, %v825_v47  ;;  %v1550_v58 = vpack.c.bf16 %v1504_v20, %v1502_v24  ;;  %v4050_v32 = vmul.f32 %v1108_v25, %v3497_v3  ;;  %v1126_v16 = vmul.f32 %v4018_v19, %v3923_v61 }
 0x17d   : > { %4835 = vst [vmem:[#allocation48_spill] sm:$0xff] %v4039_v15  ;;  %v1141_v46 = vmul.f32 %v4023_v22, %v3944_v9  ;;  %2679 = vpow2.f32 %v2257_v55  ;;  %v2674_v21 = vpop.eup %2673  ;;  %v1337_v27 = vsub.f32 1.0, %v1336_v56  ;;  %vm1116_vm8 = vweird.f32 %v3949_v14 }
 0x17e   : > { %4837 = vst [vmem:[#allocation27_spill] sm:$0xff] %v4046_v2  ;;  %v2269_v40 = vmul.f32 -1.442695, %v4012_v51  ;;  %v1503_v8 = vmul.f32 %v4838_v50, %v823_v45  ;;  %1702 = vmatmul.bf16.vlgmr.msrb.gmra.mxu0 %v1550_v58  ;;  %v4059_v20 = vor.u32 1.1754944e-38, %v1121_v30  ;;  %2681 = vpow2.f32 %v2268_v44  ;;  %vm4073_vm9 = vmor %vm1115_vm7, %vm1116_vm8 }
 0x17f   : > { %v2676_v41 = vpop.eup %2675  ;;  %v1156_v3 = vmul.f32 %v4041_v11, %v3963_v35  ;;  %v2270_v25 = vmul.f32 -1.442695, %v4039_v15  ;;  %v4065_v47 = vadd.f32 %v3925_v49, %v1323_v28  ;;  %v4068_v55 = vadd.f32 %v3949_v14, %v1113_v13 }
 0x180   : > { %v2271_v56 = vmul.f32 -1.442695, %v4046_v2  ;;  %v1551_v24 = vpack.c.bf16 %v1505_v6, %v1503_v8  ;;  %vm4077_vm10 = vcmp.eq.f32.partialorder %v1119_v23, 8.507059e+37  ;;  %v1127_v44 = vsub.f32 1.0, %v1126_v16  ;;  %v4091_v8 = vpop.f32.mrf.mxu2 }
 0x181   : > { %v2678_v45 = vpop.eup %2677  ;;  %v1134_v28 = vand.u32 2147483647, %v3923_v61  ;;  %v1142_v50 = vsub.f32 1.0, %v1141_v46  ;;  %v4082_v13 = vadd.f32 1.0, %v2674_v21  ;;  %v4085_v2 = vmul.f32 %v4006_v37, %v1337_v27  ;;  %v4093_v23 = vpop.f32.mrf.mxu3 }
 0x182   : > { %2683 = vpow2.f32 %v2269_v40  ;;  %v4087_v6 = vadd.f32 1.0, %v2676_v41  ;;  %1751 = vmatmul.bf16.vlgmr.msrb.gmra.mxu1 %v1551_v24  ;;  %v781_v26 = vadd.f32 %v3968_v31, %v3966_v10  ;;  %vm1130_vm11 = vweird.f32 %v3923_v61 }
 0x183   : > { %v2680_v16 = vpop.eup %2679  ;;  %v1136_v46 = vand.u32 2147483648, %v3923_v61  ;;  %v1157_v21 = vsub.f32 1.0, %v1156_v3  ;;  %2685 = vpow2.f32 %v2270_v25  ;;  %v1118_v27 = vsel %vm4073_vm9, %v3949_v14, %v4068_v55 }
 0x184   : > { %2687 = vpow2.f32 %v2271_v56  ;;  %v4101_v40 = vadd.f32 1.0, %v2678_v45  ;;  %v779_v31 = vadd.f32 %v3858_v62, %v3966_v10  ;;  %v2682_v41 = vpop.eup %2681  ;;  %v1128_v24 = vmul.f32 %v4018_v19, %v1127_v44 }
 0x185   : > { %vm1131_vm12 = vweird.f32 %v4018_v19  ;;  %vm4107_vm13 = vcmp.eq.f32.partialorder %v1134_v28, 8.507059e+37  ;;  %v1143_v3 = vmul.f32 %v4023_v22, %v1142_v50  ;;  %2689 = vrcp.f32 %v4082_v13 }
 0x186   : > { %2691 = vrcp.f32 %v4087_v6  ;;  %v4114_v14 = vadd.f32 1.0, %v2680_v16  ;;  %v1508_v25 = vmul.f32 %v3988_v29, %v781_v26  ;;  %v830_v62 = vadd.f32 %v3970_v63, %v4004_v57  ;;  %vm4136_vm2 = vmor %vm1130_vm11, %vm1131_vm12  ;;  %v4855_v16 = vld [vmem:[#allocation38_spill] sm:$0xff] }
 0x187   : > { %vm1145_vm14 = vweird.f32 %v3944_v9  ;;  %v1149_v55 = vand.u32 2147483647, %v3944_v9  ;;  %v1151_v56 = vand.u32 2147483648, %v3944_v9  ;;  %v1158_v45 = vmul.f32 %v4041_v11, %v1157_v21 }
 0x188   : > { %v2684_v58 = vpop.eup %2683  ;;  %vm1146_vm15 = vweird.f32 %v4023_v22  ;;  %2693 = vrcp.f32 %v4101_v40  ;;  %v1506_v44 = vmul.f32 %v3902_v34, %v779_v31  ;;  %v828_v29 = vadd.f32 %v3860_v4, %v4004_v57  ;;  %v4143_v31 = vpop.f32.mrf.mxu2 }
 0x189   : > { %v2686_v28 = vpop.eup %2685  ;;  %v1129_v63 = vadd.f32 %v4018_v19, %v1128_v24  ;;  %vm1160_vm0 = vweird.f32 %v3963_v35  ;;  %vm1161_vm1 = vweird.f32 %v4041_v11  ;;  %v1166_v50 = vand.u32 2147483648, %v3963_v35  ;;  %v4145_v24 = vpop.f32.mrf.mxu3  ;;  %vm4155_vm3 = vmor %vm1145_vm14, %vm1146_vm15 }
 0x18a   : > { %v2688_v26 = vpop.eup %2687  ;;  %v1144_v4 = vadd.f32 %v4023_v22, %v1143_v3  ;;  %2695 = vrcp.f32 %v4114_v14  ;;  %v1509_v34 = vmul.f32 %v4050_v32, %v830_v62  ;;  %v1552_v21 = vpack.c.bf16 %v1508_v25, %v1506_v44  ;;  %vm4172_vm5 = vmor %vm1160_vm0, %vm1161_vm1 }
 0x18b   : > { %v4147_v51 = vpop.eup %2689  ;;  %v1137_v42 = vor.u32 1.1754944e-38, %v1136_v46  ;;  %v4149_v39 = vadd.f32 1.0, %v2682_v41  ;;  %v1159_v32 = vadd.f32 %v4041_v11, %v1158_v45  ;;  %v1164_v3 = vand.u32 2147483647, %v3963_v35 }
 0x18c   : > { %v4161_v25 = vpop.eup %2691  ;;  %v1123_v46 = vsel %vm4077_vm10, %v4059_v20, %v1118_v27  ;;  %v4166_v41 = vadd.f32 1.0, %v2684_v58  ;;  %v4176_v62 = vadd.f32 1.0, %v2686_v28  ;;  %v1507_v45 = vmul.f32 %v3909_v48, %v828_v29  ;;  %v4853_v28 = vld [vmem:[#allocation30_spill] sm:$0xff] }
 0x18d   : > { %v1133_v44 = vsel %vm4136_vm2, %v4018_v19, %v1129_v63  ;;  %vm4182_vm6 = vcmp.eq.f32.partialorder %v1149_v55, 8.507059e+37  ;;  %v1152_v30 = vor.u32 1.1754944e-38, %v1151_v56  ;;  %v1167_v27 = vor.u32 1.1754944e-38, %v1166_v50  ;;  %v4859_v20 = vld [vmem:[#allocation42_spill] sm:$0xff] }
 0x18e   : > { %v4186_v58 = vpop.eup %2693  ;;  %v1148_v35 = vsel %vm4155_vm3, %v4023_v22, %v1144_v4  ;;  %v4193_v18 = vadd.f32 %v4853_v28, %v3325_v52  ;;  %v1201_v48 = vmul.f32 %v4147_v51, %v4082_v13  ;;  %1707 = vmatmul.bf16.gmra.mxu0 %v1552_v21  ;;  %v1553_v19 = vpack.c.bf16 %v1509_v34, %v1507_v45  ;;  %v4857_v45 = vld [vmem:[#allocation31_spill] sm:$0xff] }
 0x18f   : > { %2697 = vrcp.f32 %v4149_v39  ;;  %v1163_v55 = vsel %vm4172_vm5, %v4041_v11, %v1159_v32  ;;  %vm1165_vm7 = vcmp.eq.f32.partialorder %v1164_v3, 8.507059e+37  ;;  %v1171_v56 = vmul.f32 %v4161_v25, %v4087_v6  ;;  %v4856_v32 = vld [vmem:[#allocation40_spill] sm:$0xff] }
 0x190   : > { %4854 = vst [vmem:[#allocation34_spill] sm:$0xff] %v4193_v18  ;;  %v4203_v22 = vpop.eup %2695  ;;  %v4207_v29 = vadd.f32 %v4006_v37, %v4085_v2  ;;  %v1138_v63 = vsel %vm4107_vm13, %v1137_v42, %v1133_v44  ;;  %2699 = vrcp.f32 %v4166_v41  ;;  %v4212_v50 = vadd.f32 1.0, %v2688_v26  ;;  %v4223_v15 = vpop.f32.mrf.mxu2 }
 0x191   : > { %v1478_v4 = vmul.f32 %v1123_v46, %v4855_v16  ;;  %v1153_v11 = vsel %vm4182_vm6, %v1152_v30, %v1148_v35  ;;  %2701 = vrcp.f32 %v4176_v62  ;;  %v1216_v34 = vmul.f32 %v4186_v58, %v4101_v40  ;;  %v4225_v26 = vpop.f32.mrf.mxu3 }
 0x192   : > { %v1168_v21 = vsel %vm1165_vm7, %v1167_v27, %v1163_v55  ;;  %v2272_v2 = vmul.f32 -1.442695, %v4193_v18  ;;  %v1202_v61 = vsub.f32 1.0, %v1201_v48  ;;  %1756 = vmatmul.bf16.gmra.mxu1 %v1553_v19  ;;  %v786_v42 = vadd.f32 %v4091_v8, %v3966_v10 }
 0x193   : > { %v1479_v3 = vmul.f32 %v1138_v63, %v4856_v32  ;;  %v1172_v46 = vsub.f32 1.0, %v1171_v56  ;;  %v1186_v9 = vmul.f32 %v4203_v22, %v4114_v14  ;;  %v4232_v44 = vadd.f32 %v4857_v45, %v3328_v53 }
 0x194   : > { %v1480_v30 = vmul.f32 %v1153_v11, %v4859_v20  ;;  %2703 = vrcp.f32 %v4212_v50  ;;  %vm1175_vm8 = vweird.f32 %v4087_v6  ;;  %v784_v8 = vadd.f32 %v4031_v60, %v3966_v10 }
 0x195   : > { %4858 = vst [vmem:[#allocation30_spill] sm:$0xff] %v4232_v44  ;;  %v4239_v27 = vpop.eup %2697  ;;  %v1481_v35 = vmul.f32 %v1168_v21, %v3771_v5  ;;  %v1179_v28 = vand.u32 2147483647, %v4087_v6  ;;  %v1181_v48 = vand.u32 2147483648, %v4087_v6  ;;  %v1217_v19 = vsub.f32 1.0, %v1216_v34 }
 0x196   : > { %v4244_v55 = vpop.eup %2699  ;;  %2705 = vpow2.f32 %v2272_v2  ;;  %v1203_v56 = vmul.f32 %v4147_v51, %v1202_v61  ;;  %v1512_v63 = vmul.f32 %v1480_v30, %v786_v42  ;;  %v835_v16 = vadd.f32 %v4093_v23, %v4004_v57 }
 0x197   : > { %v4249_v11 = vpop.eup %2701  ;;  %v1173_v60 = vmul.f32 %v4161_v25, %v1172_v46  ;;  %vm1176_vm9 = vweird.f32 %v4161_v25  ;;  %v1187_v5 = vsub.f32 1.0, %v1186_v9  ;;  %v2273_v21 = vmul.f32 -1.442695, %v4232_v44  ;;  %v4865_v44 = vld [vmem:[#allocation33_spill] sm:$0xff] }
 0x198   : > { %vm1205_vm10 = vweird.f32 %v4082_v13  ;;  %vm1206_vm11 = vweird.f32 %v4147_v51  ;;  %v1510_v34 = vmul.f32 %v1478_v4, %v784_v8  ;;  %v833_v2 = vadd.f32 %v4033_v36, %v4004_v57  ;;  %v793_v4 = vpop.f32.mrf.mxu2  ;;  %vm4292_vm2 = vmor %vm1175_vm8, %vm1176_vm9 }
 0x199   : > { %vm1190_vm12 = vweird.f32 %v4114_v14  ;;  %v1194_v23 = vand.u32 2147483647, %v4114_v14  ;;  %v1211_v61 = vand.u32 2147483648, %v4082_v13  ;;  %v1218_v42 = vmul.f32 %v4186_v58, %v1217_v19  ;;  %v842_v30 = vpop.f32.mrf.mxu3  ;;  %vm4271_vm13 = vmor %vm1205_vm10, %vm1206_vm11  ;;  %v4862_v19 = vld [vmem:[#allocation32_spill] sm:$0xff] }
 0x19a   : > { %v4262_v32 = vpop.eup %2703  ;;  %v1204_v46 = vadd.f32 %v4147_v51, %v1203_v56  ;;  %v1209_v9 = vand.u32 2147483647, %v4082_v13  ;;  %v1513_v45 = vmul.f32 %v1481_v35, %v835_v16  ;;  %v1554_v20 = vpack.c.bf16 %v1512_v63, %v1510_v34 }
 0x19b   : > { %v1174_v36 = vadd.f32 %v4161_v25, %v1173_v60  ;;  %vm1220_vm14 = vweird.f32 %v4101_v40  ;;  %vm1221_vm15 = vweird.f32 %v4186_v58  ;;  %v4279_v35 = vadd.f32 %v4862_v19, %v3325_v52 }
 0x19c   : > { %v4281_v56 = vpop.eup %2705  ;;  %vm1326_vm0 = vweird.f32 %v3925_v49  ;;  %v1188_v63 = vmul.f32 %v4203_v22, %v1187_v5  ;;  %v1224_v13 = vand.u32 2147483647, %v4101_v40  ;;  %v1226_v16 = vand.u32 2147483648, %v4101_v40  ;;  %vm4311_vm7 = vmor %vm1220_vm14, %vm1221_vm15 }
 0x19d   : > { %v1511_v60 = vmul.f32 %v1479_v3, %v833_v2  ;;  %vm1341_vm1 = vweird.f32 %v4006_v37  ;;  %v1196_v34 = vand.u32 2147483648, %v4114_v14  ;;  %v1212_v19 = vor.u32 1.1754944e-38, %v1211_v61  ;;  %v4881_v3 = vld [vmem:[#allocation41_spill] sm:$0xff] }
 0x19e   : > { %v1219_v5 = vadd.f32 %v4186_v58, %v1218_v42  ;;  %v4300_v18 = vadd.f32 %v4865_v44, %v3328_v53  ;;  %vm1325_vm3 = vweird.f32 %v3830_v1  ;;  %vm1191_vm5 = vweird.f32 %v4203_v22  ;;  %1712 = vmatmul.bf16.gmra.mxu0 %v1554_v20 }
 0x19f   : > { %v1208_v6 = vsel %vm4271_vm13, %v4147_v51, %v1204_v46  ;;  %vm1210_vm6 = vcmp.eq.f32.partialorder %v1209_v9, 8.507059e+37  ;;  %v1555_v53 = vpack.c.bf16 %v1513_v45, %v1511_v60  ;;  %vm1340_vm8 = vweird.f32 %v3896_v54  ;;  %vm4333_vm11 = vmor %vm1190_vm12, %vm1191_vm5 }
 0x1a0   : > { %vm4316_vm9 = vcmp.eq.f32.partialorder %v1179_v28, 8.507059e+37  ;;  %v1182_v2 = vor.u32 1.1754944e-38, %v1181_v48  ;;  %2707 = vpow2.f32 %v2273_v21  ;;  %v2274_v51 = vmul.f32 -1.442695, %v4279_v35  ;;  %vm4386_vm12 = vmor %vm1325_vm3, %vm1326_vm0 }
 0x1a1   : > { %v1178_v40 = vsel %vm4292_vm2, %v4161_v25, %v1174_v36  ;;  %v1189_v61 = vadd.f32 %v4203_v22, %v1188_v63  ;;  %vm4325_vm10 = vcmp.eq.f32.partialorder %v1224_v13, 8.507059e+37  ;;  %v1227_v46 = vor.u32 1.1754944e-38, %v1226_v16  ;;  %v844_v63 = vpop.f32.mrf.mxu3  ;;  %vm4401_vm15 = vmor %vm1340_vm8, %vm1341_vm1 }
 0x1a2   : > { %v1213_v48 = vsel %vm1210_vm6, %v1212_v19, %v1208_v6  ;;  %v1223_v25 = vsel %vm4311_vm7, %v4186_v58, %v1219_v5  ;;  %v794_v21 = vadd.f32 %v793_v4, %v3966_v10  ;;  %v843_v9 = vadd.f32 %v842_v30, %v4004_v57  ;;  %1761 = vmatmul.bf16.gmra.mxu1 %v1555_v53  ;;  %v795_v4 = vpop.f32.mrf.mxu2  ;;  %v4880_v5 = vld [vmem:[#allocation39_spill] sm:$0xff] }
 0x1a3   : > { %v4874_v45 = vand.u32 2147483647, %v3637_v43  ;;  %vm4348_vm14 = vcmp.eq.f32.partialorder %v1194_v23, 8.507059e+37  ;;  %v1197_v36 = vor.u32 1.1754944e-38, %v1196_v34  ;;  %v2275_v8 = vmul.f32 -1.442695, %v4300_v18 }
 0x1a4   : > { %v791_v58 = vadd.f32 %v4223_v15, %v3966_v10  ;;  %v1183_v43 = vsel %vm4316_vm9, %v1182_v2, %v1178_v40  ;;  %2709 = vpow2.f32 %v2274_v51  ;;  %v796_v30 = vadd.f32 %v795_v4, %v3966_v10  ;;  %v4879_v34 = vld [vmem:[#allocation36_spill] sm:$0xff] }
 0x1a5   : > { %vm4344_vm13 = vcmp.eq.f32.partialorder %v4874_v45, 8.507059e+37  ;;  %v845_v23 = vadd.f32 %v844_v63, %v4004_v57  ;;  %v1193_v13 = vsel %vm4333_vm11, %v4203_v22, %v1189_v61  ;;  %v1484_v16 = vmul.f32 %v1213_v48, %v3947_v17 }
 0x1a6   : > { %v1228_v60 = vsel %vm4325_vm10, %v1227_v46, %v1223_v25  ;;  %v789_v15 = vadd.f32 %v4143_v31, %v3966_v10  ;;  %v2708_v52 = vpop.eup %2707  ;;  %v4368_v19 = vmul.f32 %v4879_v34, %v794_v21  ;;  %v4371_v6 = vmul.f32 %v4880_v5, %v843_v9 }
 0x1a7   : > { %v4374_v53 = vmul.f32 %v4881_v3, %v796_v30  ;;  %v4377_v22 = vmul.f32 %v3899_v12, %v845_v23  ;;  %v1482_v17 = vmul.f32 %v1183_v43, %v3958_v33  ;;  %2711 = vpow2.f32 %v2275_v8 }
 0x1a8   : > { %v1516_v44 = vmul.f32 %v1484_v16, %v791_v58  ;;  %v840_v31 = vadd.f32 %v4225_v26, %v4004_v57  ;;  %v1346_v51 = vand.u32 2147483648, %v3896_v54  ;;  %v1198_v12 = vsel %vm4348_vm14, %v1197_v36, %v1193_v13 }
 0x1a9   : > { %v1558_v33 = vpack.c.bf16 %v4374_v53, %v4368_v19  ;;  %v1559_v40 = vpack.c.bf16 %v4377_v22, %v4371_v6  ;;  %v1344_v61 = vand.u32 2147483647, %v3896_v54  ;;  %v1485_v42 = vmul.f32 %v1228_v60, %v3979_v7 }
 0x1aa   : > { %v1514_v46 = vmul.f32 %v1482_v17, %v789_v15  ;;  %v838_v28 = vadd.f32 %v4145_v24, %v4004_v57  ;;  %v2710_v48 = vpop.eup %2709  ;;  %v1328_v25 = vsel %vm4386_vm12, %v3925_v49, %v4065_v47  ;;  %v1343_v21 = vsel %vm4401_vm15, %v4006_v37, %v4207_v29  ;;  %v798_v36 = vpop.f32.mrf.mxu2  ;;  %v4886_v47 = vld [vmem:[#allocation44_spill] sm:$0xff]  ;;  %v4888_v29 = vld [vmem:[#allocation43_spill] sm:$0xff] }
 0x1ab   : > { %v1351_v54 = vmul.f32 %v4239_v27, %v4149_v39  ;;  %v1366_v7 = vmul.f32 %v4244_v55, %v4166_v41  ;;  %v1381_v24 = vmul.f32 %v4249_v11, %v4176_v62  ;;  %v1483_v9 = vmul.f32 %v1198_v12, %v3994_v38  ;;  %v847_v49 = vpop.f32.mrf.mxu3 }
 0x1ac   : > { %v1517_v45 = vmul.f32 %v1485_v42, %v840_v31  ;;  %v1556_v14 = vpack.c.bf16 %v1516_v44, %v1514_v46  ;;  %v4887_v37 = vsel %vm3915_vm4, %v3727_v59, %v4886_v47  ;;  %v4889_v58 = vand.u32 2147483648, %v3830_v1  ;;  %v4892_v44 = vld [vmem:[#allocation45_spill] sm:$0xff] }
 0x1ad   : > { %v1318_v8 = vsel %vm4344_vm13, %v4888_v29, %v4887_v37  ;;  %v1347_v63 = vor.u32 1.1754944e-38, %v1346_v51  ;;  %v1396_v38 = vmul.f32 %v4262_v32, %v4212_v50  ;;  %v2712_v43 = vpop.eup %2711  ;;  %v4890_v30 = vand.u32 2147483647, %v3830_v1  ;;  %v4891_v1 = vld [vmem:[#allocation28_spill] sm:$0xff]  ;;  %v4894_v51 = vld [vmem:[#allocation35_spill] sm:$0xff] }
 0x1ae   : > { %v1332_v4 = vor.u32 1.1754944e-38, %v4889_v58  ;;  %vm1345_vm1 = vcmp.eq.f32.partialorder %v1344_v61, 8.507059e+37  ;;  %v4439_v0 = vadd.f32 1.0, %v4281_v56  ;;  %v1515_v59 = vmul.f32 %v1483_v9, %v838_v28  ;;  %1717 = vmatmul.bf16.gmra.mxu0 %v1556_v14  ;;  %v4893_v56 = vld [vmem:[#allocation29_spill] sm:$0xff] }
 0x1af   : > { %vm1330_vm0 = vcmp.eq.f32.partialorder %v4890_v30, 8.507059e+37  ;;  %v1348_v13 = vsel %vm1345_vm1, %v1347_v63, %v1343_v21  ;;  %v1352_v20 = vsub.f32 1.0, %v1351_v54  ;;  %v4441_v16 = vadd.f32 1.0, %v2708_v52  ;;  %v4895_v52 = vld [vmem:[#allocation37_spill] sm:$0xff] }
 0x1b0   : > { %v1333_v23 = vsel %vm1330_vm0, %v1332_v4, %v1328_v25  ;;  %v1367_v60 = vsub.f32 1.0, %v1366_v7  ;;  %v1382_v15 = vsub.f32 1.0, %v1381_v24  ;;  %v4443_v34 = vadd.f32 1.0, %v2710_v48 }
 0x1b1   : > { %v1557_v5 = vpack.c.bf16 %v1517_v45, %v1515_v59  ;;  %v1397_v3 = vsub.f32 1.0, %v1396_v38  ;;  %v4445_v17 = vadd.f32 1.0, %v2712_v43  ;;  %v1490_v31 = vmul.f32 %v4892_v44, %v4891_v1 }
 0x1b2   : > { %v1491_v2 = vmul.f32 %v1318_v8, %v4893_v56  ;;  %v1492_v12 = vmul.f32 %v1333_v23, %v4894_v51  ;;  %2713 = vrcp.f32 %v4439_v0  ;;  %v1493_v26 = vmul.f32 %v1348_v13, %v4895_v52  ;;  %v800_v25 = vpop.f32.mrf.mxu2  ;;  %v4905_v8 = vld [vmem:[#allocation47_spill] sm:$0xff] }
 0x1b3   : > { %2715 = vrcp.f32 %v4441_v16  ;;  %v799_v61 = vadd.f32 %v798_v36, %v3966_v10  ;;  %v848_v42 = vadd.f32 %v847_v49, %v4004_v57  ;;  %v1353_v46 = vmul.f32 %v4239_v27, %v1352_v20  ;;  %1766 = vmatmul.bf16.gmra.mxu1 %v1557_v5  ;;  %v849_v21 = vpop.f32.mrf.mxu3 }
 0x1b4   : > { %v1368_v28 = vmul.f32 %v4244_v55, %v1367_v60  ;;  %v1383_v48 = vmul.f32 %v4249_v11, %v1382_v15  ;;  %2717 = vrcp.f32 %v4443_v34  ;;  %v1398_v54 = vmul.f32 %v4262_v32, %v1397_v3 }
 0x1b5   : > { %2719 = vrcp.f32 %v4445_v17  ;;  %v801_v7 = vadd.f32 %v800_v25, %v3966_v10  ;;  %v850_v24 = vadd.f32 %v849_v21, %v4004_v57  ;;  %vm1355_vm4 = vweird.f32 %v4149_v39 }
 0x1b6   : > { %vm1356_vm2 = vweird.f32 %v4239_v27  ;;  %vm1370_vm3 = vweird.f32 %v4166_v41  ;;  %vm1371_vm5 = vweird.f32 %v4244_v55  ;;  %v4468_v9 = vmul.f32 %v1490_v31, %v799_v61 }
 0x1b7   : > { %v4470_v45 = vmul.f32 %v1491_v2, %v848_v42  ;;  %v4472_v14 = vmul.f32 %v1492_v12, %v801_v7  ;;  %v4474_v36 = vmul.f32 %v1493_v26, %v850_v24  ;;  %v1354_v47 = vadd.f32 %v4239_v27, %v1353_v46  ;;  %vm4484_vm8 = vmor %vm1355_vm4, %vm1356_vm2 }
 0x1b8   : > { %v4476_v49 = vpop.eup %2713  ;;  %v1369_v37 = vadd.f32 %v4244_v55, %v1368_v28  ;;  %vm1386_vm6 = vweird.f32 %v4249_v11  ;;  %vm1401_vm7 = vweird.f32 %v4262_v32  ;;  %v1384_v58 = vadd.f32 %v4249_v11, %v1383_v48  ;;  %vm4502_vm9 = vmor %vm1370_vm3, %vm1371_vm5 }
 0x1b9   : > { %v4482_v29 = vpop.eup %2715  ;;  %v1399_v4 = vadd.f32 %v4262_v32, %v1398_v54  ;;  %v1560_v63 = vpack.c.bf16 %v4472_v14, %v4468_v9  ;;  %v1561_v38 = vpack.c.bf16 %v4474_v36, %v4470_v45  ;;  %v1359_v30 = vand.u32 2147483647, %v4149_v39  ;;  %v1534_v36 = vld [vmem:[#allocation2 + $0x30] sm:$0xff] }
 0x1ba   : > { %v4494_v43 = vpop.eup %2717  ;;  %v1361_v59 = vand.u32 2147483648, %v4149_v39  ;;  %vm1385_vm10 = vweird.f32 %v4176_v62  ;;  %v1376_v20 = vand.u32 2147483648, %v4166_v41  ;;  %v1391_v39 = vand.u32 2147483648, %v4176_v62  ;;  %v803_v31 = vpop.f32.mrf.mxu2 }
 0x1bb   : > { %v4507_v13 = vpop.eup %2719  ;;  %vm4512_vm11 = vmor %vm1385_vm10, %vm1386_vm6  ;;  %vm1400_vm13 = vweird.f32 %v4212_v50  ;;  %v1406_v15 = vand.u32 2147483648, %v4212_v50  ;;  %v1374_v5 = vand.u32 2147483647, %v4166_v41  ;;  %v1389_v3 = vand.u32 2147483647, %v4176_v62  ;;  %v852_v56 = vpop.f32.mrf.mxu3 }
 0x1bc   : > { %vm4523_vm14 = vmor %vm1400_vm13, %vm1401_vm7  ;;  %v1404_v44 = vand.u32 2147483647, %v4212_v50  ;;  %v1358_v2 = vsel %vm4484_vm8, %v4239_v27, %v1354_v47  ;;  %v1373_v41 = vsel %vm4502_vm9, %v4244_v55, %v1369_v37  ;;  %v1388_v62 = vsel %vm4512_vm11, %v4249_v11, %v1384_v58  ;;  %v4904_v47 = vld [vmem:[#allocation46_spill] sm:$0xff] }
 0x1bd   : > { %v1403_v51 = vsel %vm4523_vm14, %v4262_v32, %v1399_v4  ;;  %v1411_v50 = vmul.f32 %v4476_v49, %v4439_v0  ;;  %v1426_v12 = vmul.f32 %v4482_v29, %v4441_v16  ;;  %v1441_v27 = vmul.f32 %v4494_v43, %v4443_v34 }
 0x1be   : > { %v1456_v55 = vmul.f32 %v4507_v13, %v4445_v17  ;;  %v1362_v52 = vor.u32 1.1754944e-38, %v1361_v59  ;;  %v1377_v26 = vor.u32 1.1754944e-38, %v1376_v20  ;;  %v1392_v61 = vor.u32 1.1754944e-38, %v1391_v39  ;;  %1722 = vmatmul.bf16.gmra.mxu0 %v1558_v33  ;;  %v4906_v33 = vld [vmem:[#allocation48_spill] sm:$0xff] }
 0x1bf   : > { %v1407_v11 = vor.u32 1.1754944e-38, %v1406_v15  ;;  %vm1360_vm12 = vcmp.eq.f32.partialorder %v1359_v30, 8.507059e+37  ;;  %vm1375_vm15 = vcmp.eq.f32.partialorder %v1374_v5, 8.507059e+37  ;;  %vm1390_vm0 = vcmp.eq.f32.partialorder %v1389_v3, 8.507059e+37  ;;  %v4907_v30 = vld [vmem:[#allocation27_spill] sm:$0xff] }
 0x1c0   : > { %vm1405_vm1 = vcmp.eq.f32.partialorder %v1404_v44, 8.507059e+37  ;;  %v1363_v32 = vsel %vm1360_vm12, %v1362_v52, %v1358_v2  ;;  %v1378_v42 = vsel %vm1375_vm15, %v1377_v26, %v1373_v41  ;;  %v1393_v46 = vsel %vm1390_vm0, %v1392_v61, %v1388_v62 }
 0x1c1   : > { %v1408_v28 = vsel %vm1405_vm1, %v1407_v11, %v1403_v51  ;;  %v1412_v48 = vsub.f32 1.0, %v1411_v50  ;;  %v1427_v25 = vsub.f32 1.0, %v1426_v12  ;;  %v1442_v21 = vsub.f32 1.0, %v1441_v27 }
 0x1c2   : > { %v1457_v54 = vsub.f32 1.0, %v1456_v55  ;;  %v804_v7 = vadd.f32 %v803_v31, %v3966_v10  ;;  %v853_v24 = vadd.f32 %v852_v56, %v4004_v57  ;;  %v1494_v37 = vmul.f32 %v1363_v32, %v4904_v47  ;;  %v805_v19 = vpop.f32.mrf.mxu2 }
 0x1c3   : > { %v1495_v58 = vmul.f32 %v1378_v42, %v4905_v8  ;;  %1771 = vmatmul.bf16.gmra.mxu1 %v1559_v40  ;;  %v854_v53 = vpop.f32.mrf.mxu3  ;;  %v1496_v4 = vmul.f32 %v1393_v46, %v4906_v33  ;;  %v1497_v59 = vmul.f32 %v1408_v28, %v4907_v30  ;;  %v806_v23 = vadd.f32 %v805_v19, %v3966_v10  ;;  %v4917_v8 = vld [vmem:[#allocation30_spill] sm:$0xff] }
 0x1c4   : > { %v855_v20 = vadd.f32 %v854_v53, %v4004_v57  ;;  %v1413_v60 = vmul.f32 %v4476_v49, %v1412_v48  ;;  %v1428_v39 = vmul.f32 %v4482_v29, %v1427_v25  ;;  %v1443_v15 = vmul.f32 %v4494_v43, %v1442_v21 }
 0x1c5   : > { %v1458_v5 = vmul.f32 %v4507_v13, %v1457_v54  ;;  %v4566_v6 = vmul.f32 %v1494_v37, %v804_v7  ;;  %v4568_v22 = vmul.f32 %v1495_v58, %v853_v24  ;;  %v4570_v40 = vmul.f32 %v1496_v4, %v806_v23  ;;  %v4916_v37 = vld [vmem:[#allocation34_spill] sm:$0xff] }
 0x1c6   : > { %v4572_v3 = vmul.f32 %v1497_v59, %v855_v20  ;;  %vm1415_vm4 = vweird.f32 %v4439_v0  ;;  %vm1416_vm2 = vweird.f32 %v4476_v49  ;;  %v1419_v1 = vand.u32 2147483647, %v4439_v0 }
 0x1c7   : > { %v1421_v44 = vand.u32 2147483648, %v4439_v0  ;;  %vm1431_vm3 = vweird.f32 %v4482_v29  ;;  %v1562_v31 = vpack.c.bf16 %v4570_v40, %v4566_v6  ;;  %v1414_v2 = vadd.f32 %v4476_v49, %v1413_v60  ;;  %vm4587_vm7 = vmor %vm1415_vm4, %vm1416_vm2 }
 0x1c8   : > { %v1563_v56 = vpack.c.bf16 %v4572_v3, %v4568_v22  ;;  %v1429_v41 = vadd.f32 %v4482_v29, %v1428_v39  ;;  %vm1430_vm5 = vweird.f32 %v4441_v16  ;;  %vm1446_vm6 = vweird.f32 %v4494_v43  ;;  %v1536_v22 = vld [vmem:[#allocation2 + $0x58] sm:$0xff] }
 0x1c9   : > { %v1436_v0 = vand.u32 2147483648, %v4441_v16  ;;  %v1444_v51 = vadd.f32 %v4494_v43, %v1443_v15  ;;  %v1459_v50 = vadd.f32 %v4507_v13, %v1458_v5  ;;  %vm1461_vm8 = vweird.f32 %v4507_v13  ;;  %vm4595_vm9 = vmor %vm1430_vm5, %vm1431_vm3 }
 0x1ca   : > { %v1434_v27 = vand.u32 2147483647, %v4441_v16  ;;  %vm1445_vm10 = vweird.f32 %v4443_v34  ;;  %v1451_v55 = vand.u32 2147483648, %v4443_v34  ;;  %v1466_v52 = vand.u32 2147483648, %v4445_v17  ;;  %v808_v26 = vpop.f32.mrf.mxu2 }
 0x1cb   : > { %v857_v61 = vpop.f32.mrf.mxu3  ;;  %vm4603_vm11 = vmor %vm1445_vm10, %vm1446_vm6  ;;  %v1449_v32 = vand.u32 2147483647, %v4443_v34  ;;  %vm1460_vm13 = vweird.f32 %v4445_v17  ;;  %v1464_v42 = vand.u32 2147483647, %v4445_v17  ;;  %v1418_v16 = vsel %vm4587_vm7, %v4476_v49, %v1414_v2 }
 0x1cc   : > { %v1433_v46 = vsel %vm4595_vm9, %v4482_v29, %v1429_v41  ;;  %vm4616_vm14 = vmor %vm1460_vm13, %vm1461_vm8  ;;  %v1422_v48 = vor.u32 1.1754944e-38, %v1421_v44  ;;  %v1437_v25 = vor.u32 1.1754944e-38, %v1436_v0  ;;  %v1448_v34 = vsel %vm4603_vm11, %v4494_v43, %v1444_v51  ;;  %v1538_v0 = vld [vmem:[#allocation2 + $0x50] sm:$0xff] }
 0x1cd   : > { %v1463_v17 = vsel %vm4616_vm14, %v4507_v13, %v1459_v50  ;;  %vm1420_vm12 = vcmp.eq.f32.partialorder %v1419_v1, 8.507059e+37  ;;  %vm1435_vm15 = vcmp.eq.f32.partialorder %v1434_v27, 8.507059e+37  ;;  %v1452_v49 = vor.u32 1.1754944e-38, %v1451_v55  ;;  %v1539_v55 = vld [vmem:[#allocation2 + $0x68] sm:$0xff] }
 0x1ce   : > { %v1467_v21 = vor.u32 1.1754944e-38, %v1466_v52  ;;  %1727 = vmatmul.bf16.gmra.mxu0 %v1560_v63  ;;  %v1423_v29 = vsel %vm1420_vm12, %v1422_v48, %v1418_v16  ;;  %v1438_v54 = vsel %vm1435_vm15, %v1437_v25, %v1433_v46  ;;  %vm1450_vm0 = vcmp.eq.f32.partialorder %v1449_v32, 8.507059e+37  ;;  %v1540_v32 = vld [vmem:[#allocation2 + $0x8] sm:$0xff] }
 0x1cf   : > { %vm1465_vm1 = vcmp.eq.f32.partialorder %v1464_v42, 8.507059e+37  ;;  %v1453_v7 = vsel %vm1450_vm0, %v1452_v49, %v1448_v34  ;;  %v809_v43 = vadd.f32 %v808_v26, %v3966_v10  ;;  %v858_v47 = vadd.f32 %v857_v61, %v4004_v57  ;;  %v1541_v48 = vld [vmem:[#allocation2 + $0x48] sm:$0xff] }
 0x1d0   : > { %v1468_v24 = vsel %vm1465_vm1, %v1467_v21, %v1463_v17  ;;  %v1498_v13 = vmul.f32 %v1423_v29, %v4916_v37  ;;  %v1499_v58 = vmul.f32 %v1438_v54, %v4917_v8  ;;  %v1500_v63 = vmul.f32 %v1453_v7, %v4279_v35  ;;  %v1542_v21 = vld [vmem:[#allocation2 + $0x40] sm:$0xff] }
 0x1d1   : > { %v1501_v19 = vmul.f32 %v1468_v24, %v4300_v18 }
 0x1d2   : > { %v810_v9 = vpop.f32.mrf.mxu2  ;;  %v1530_v4 = vmul.f32 %v1498_v13, %v809_v43  ;;  %v1531_v30 = vmul.f32 %v1499_v58, %v858_v47  ;;  %v1543_v43 = vld [vmem:[#allocation2 + $0x20] sm:$0xff]  ;;  %v1544_v58 = vld [vmem:[#allocation2 + $0x10] sm:$0xff] }
 0x1d3   : > { %1776 = vmatmul.bf16.gmra.mxu1 %v1561_v38  ;;  %v859_v14 = vpop.f32.mrf.mxu3  ;;  %v811_v53 = vadd.f32 %v810_v9, %v3966_v10  ;;  %v1535_v10 = vld [vmem:[#allocation2] sm:$0xff] }
 0x1d4   : > { %v860_v33 = vadd.f32 %v859_v14, %v4004_v57 }
 0x1d5   : > { %v1532_v59 = vmul.f32 %v1500_v63, %v811_v53  ;;  %v1545_v53 = vld [vmem:[#allocation2 + $0x38] sm:$0xff] }
 0x1d6   : > { %v1533_v23 = vmul.f32 %v1501_v19, %v860_v33 }
 0x1d7   : > { %v1564_v20 = vpack.c.bf16 %v1532_v59, %v1530_v4 }
 0x1d8   : > { %v1565_v60 = vpack.c.bf16 %v1533_v23, %v1531_v30  ;;  %v1546_v23 = vld [vmem:[#allocation2 + $0x60] sm:$0xff] }
 0x1de   : > { %1732 = vmatmul.bf16.gmra.mxu0 %v1562_v31  ;;  %v1537_v31 = vld [vmem:[#allocation2 + $0x18] sm:$0xff] }
 0x1e3   : > { %1781 = vmatmul.bf16.gmra.mxu1 %v1563_v56 }
 0x1ee   : > { %1737 = vmatmul.bf16.gmra.mxu0 %v1564_v20 }
 0x1f3   : > { %1786 = vmatmul.bf16.gmra.mxu1 %v1565_v60 }
 0x1fb   : > { %v1703_v45 = vpop.f32.mrf.mxu0 }
 0x1ff   : > { %v1752_v38 = vpop.f32.mrf.mxu1 }
 0x200   : > { %v1753_v35 = vadd.f32 %v1752_v38, %v1703_v45  ;;  %v1547_v38 = vld [vmem:[#allocation2 + $0x70] sm:$0xff] }
 0x202   : > { %v1792_v39 = vadd.f32 %v1753_v35, %v1534_v36 }
 0x203   : > { %v1705_v18 = vpop.f32.mrf.mxu0 }
 0x204   : > { %1808 = vst [vmem:[#allocation2 + $0x30] sm:$0xff] %v1792_v39 }
 0x207   : > { %v1754_v15 = vpop.f32.mrf.mxu1 }
 0x208   : > { %v1755_v57 = vadd.f32 %v1754_v15, %v1705_v18  ;;  %v1548_v15 = vld [vmem:[#allocation2 + $0x78] sm:$0xff] }
 0x20a   : > { %v1793_v5 = vadd.f32 %v1755_v57, %v1535_v10 }
 0x20b   : > { %v1708_v6 = vpop.f32.mrf.mxu0 }
 0x20c   : > { %1809 = vst [vmem:[#allocation2] sm:$0xff] %v1793_v5 }
 0x20f   : > { %v1757_v40 = vpop.f32.mrf.mxu1 }
 0x210   : > { %v1758_v3 = vadd.f32 %v1757_v40, %v1708_v6  ;;  %v1549_v40 = vld [vmem:[#allocation2 + $0x28] sm:$0xff] }
 0x212   : > { %v1794_v1 = vadd.f32 %v1758_v3, %v1536_v22 }
 0x213   : > { %v1710_v44 = vpop.f32.mrf.mxu0 }
 0x214   : > { %1810 = vst [vmem:[#allocation2 + $0x58] sm:$0xff] %v1794_v1 }
 0x217   : > { %v1759_v56 = vpop.f32.mrf.mxu1 }
 0x218   : > { %v1760_v2 = vadd.f32 %v1759_v56, %v1710_v44 }
 0x21a   : > { %v1795_v41 = vadd.f32 %v1760_v2, %v1537_v31 }
 0x21b   : > { %v1713_v62 = vpop.f32.mrf.mxu0 }
 0x21c   : > { %1811 = vst [vmem:[#allocation2 + $0x18] sm:$0xff] %v1795_v41 }
 0x21f   : > { %v1762_v51 = vpop.f32.mrf.mxu1 }
 0x220   : > { %v1763_v50 = vadd.f32 %v1762_v51, %v1713_v62 }
 0x222   : > { %v1796_v12 = vadd.f32 %v1763_v50, %v1538_v0 }
 0x223   : > { %v1715_v27 = vpop.f32.mrf.mxu0 }
 0x224   : > { %1812 = vst [vmem:[#allocation2 + $0x50] sm:$0xff] %v1796_v12 }
 0x227   : > { %v1764_v52 = vpop.f32.mrf.mxu1 }
 0x228   : > { %v1765_v26 = vadd.f32 %v1764_v52, %v1715_v27 }
 0x22a   : > { %v1797_v61 = vadd.f32 %v1765_v26, %v1539_v55 }
 0x22b   : > { %v1718_v11 = vpop.f32.mrf.mxu0 }
 0x22c   : > { %1813 = vst [vmem:[#allocation2 + $0x68] sm:$0xff] %v1797_v61 }
 0x230   : > { %v1767_v42 = vpop.f32.mrf.mxu1 }
 0x231   : > { %v1768_v16 = vadd.f32 %v1767_v42, %v1718_v11 }
 0x233   : > { %v1798_v46 = vadd.f32 %v1768_v16, %v1540_v32  ;;  %v1720_v28 = vpop.f32.mrf.mxu0 }
 0x235   : > { %1814 = vst [vmem:[#allocation2 + $0x8] sm:$0xff] %v1798_v46 }
 0x238   : > { %v1769_v25 = vpop.f32.mrf.mxu1 }
 0x239   : > { %v1770_v34 = vadd.f32 %v1769_v25, %v1720_v28 }
 0x23b   : > { %v1799_v17 = vadd.f32 %v1770_v34, %v1541_v48  ;;  %v1723_v49 = vpop.f32.mrf.mxu0 }
 0x23d   : > { %1815 = vst [vmem:[#allocation2 + $0x48] sm:$0xff] %v1799_v17 }
 0x240   : > { %v1772_v29 = vpop.f32.mrf.mxu1 }
 0x241   : > { %v1773_v54 = vadd.f32 %v1772_v29, %v1723_v49 }
 0x243   : > { %v1800_v7 = vadd.f32 %v1773_v54, %v1542_v21  ;;  %v1725_v24 = vpop.f32.mrf.mxu0 }
 0x245   : > { %1816 = vst [vmem:[#allocation2 + $0x40] sm:$0xff] %v1800_v7 }
 0x248   : > { %v1774_v47 = vpop.f32.mrf.mxu1 }
 0x249   : > { %v1775_v37 = vadd.f32 %v1774_v47, %v1725_v24 }
 0x24b   : > { %v1801_v13 = vadd.f32 %v1775_v37, %v1543_v43  ;;  %v1728_v8 = vpop.f32.mrf.mxu0 }
 0x24d   : > { %1817 = vst [vmem:[#allocation2 + $0x20] sm:$0xff] %v1801_v13 }
 0x250   : > { %v1777_v9 = vpop.f32.mrf.mxu1 }
 0x251   : > { %v1778_v14 = vadd.f32 %v1777_v9, %v1728_v8 }
 0x253   : > { %v1802_v63 = vadd.f32 %v1778_v14, %v1544_v58  ;;  %v1730_v19 = vpop.f32.mrf.mxu0 }
 0x255   : > { %1818 = vst [vmem:[#allocation2 + $0x10] sm:$0xff] %v1802_v63 }
 0x258   : > { %v1779_v33 = vpop.f32.mrf.mxu1 }
 0x259   : > { %v1780_v4 = vadd.f32 %v1779_v33, %v1730_v19 }
 0x25b   : > { %v1803_v30 = vadd.f32 %v1780_v4, %v1545_v53  ;;  %v1733_v59 = vpop.f32.mrf.mxu0 }
 0x25d   : > { %1819 = vst [vmem:[#allocation2 + $0x38] sm:$0xff] %v1803_v30 }
 0x260   : > { %v1782_v20 = vpop.f32.mrf.mxu1 }
 0x261   : > { %v1783_v60 = vadd.f32 %v1782_v20, %v1733_v59 }
 0x263   : > { %v1804_v45 = vadd.f32 %v1783_v60, %v1546_v23  ;;  %v1735_v36 = vpop.f32.mrf.mxu0 }
 0x265   : > { %1820 = vst [vmem:[#allocation2 + $0x60] sm:$0xff] %v1804_v45 }
 0x268   : > { %v1784_v35 = vpop.f32.mrf.mxu1 }
 0x269   : > { %v1785_v39 = vadd.f32 %v1784_v35, %v1735_v36 }
 0x26b   : > { %v1805_v18 = vadd.f32 %v1785_v39, %v1547_v38  ;;  %v1738_v10 = vpop.f32.mrf.mxu0 }
 0x26d   : > { %1821 = vst [vmem:[#allocation2 + $0x70] sm:$0xff] %v1805_v18 }
 0x270   : > { %v1787_v57 = vpop.f32.mrf.mxu1 }
 0x271   : > { %v1788_v5 = vadd.f32 %v1787_v57, %v1738_v10 }
 0x273   : > { %v1806_v6 = vadd.f32 %v1788_v5, %v1548_v15  ;;  %v1740_v22 = vpop.f32.mrf.mxu0 }
 0x275   : > { %1822 = vst [vmem:[#allocation2 + $0x78] sm:$0xff] %v1806_v6 }
 0x278   : > { %v1789_v3 = vpop.f32.mrf.mxu1 }
 0x279   : > { %v1790_v1 = vadd.f32 %v1789_v3, %v1740_v22  ;;  %1827 = sbr.rel (%p2340_p7) target bundleno = 652 (0x28c), region = 64 }
 0x27b   : > { %v1807_v44 = vadd.f32 %v1790_v1, %v1549_v40 }
 0x27d   : > { %1823 = vst [vmem:[#allocation2 + $0x28] sm:$0xff] %v1807_v44 }
 0x27e   : > { %v1828_v31 = vld [vmem:[#allocation2 + $0x30] sm:$0xff]  ;;  %v1829_v56 = vld [vmem:[#allocation2] sm:$0xff]  ;;  %v1830_v41 = vld [vmem:[#allocation2 + $0x58] sm:$0xff] }
 0x27f   : > { %v2721_v2 = vld [vmem:[%s4919_s24] ss:$0 sm:$0xff]  ;;  %v1831_v62 = vld [vmem:[#allocation2 + $0x18] sm:$0xff]  ;;  %v1832_v0 = vld [vmem:[#allocation2 + $0x50] sm:$0xff] }
 0x280   : > { %v1833_v51 = vld [vmem:[#allocation2 + $0x68] sm:$0xff]  ;;  %v1848_v12 = vadd.f32 %v2721_v2, %v1828_v31  ;;  %v1849_v27 = vadd.f32 %v2721_v2, %v1829_v56  ;;  %v1850_v55 = vadd.f32 %v2721_v2, %v1830_v41  ;;  %v1851_v52 = vadd.f32 %v2721_v2, %v1831_v62  ;;  %v1836_v61 = vld [vmem:[#allocation2 + $0x40] sm:$0xff]  ;;  %v1838_v28 = vld [vmem:[#allocation2 + $0x10] sm:$0xff] }
 0x281   : > { %v1834_v50 = vld [vmem:[#allocation2 + $0x8] sm:$0xff]  ;;  %v1837_v11 = vld [vmem:[#allocation2 + $0x20] sm:$0xff]  ;;  %v1852_v32 = vadd.f32 %v2721_v2, %v1832_v0  ;;  %v1853_v42 = vadd.f32 %v2721_v2, %v1833_v51  ;;  %v1839_v48 = vld [vmem:[#allocation2 + $0x38] sm:$0xff]  ;;  %v1856_v49 = vadd.f32 %v2721_v2, %v1836_v61  ;;  %v1858_v47 = vadd.f32 %v2721_v2, %v1838_v28 }
 0x282   : > { %v1835_v26 = vld [vmem:[#allocation2 + $0x48] sm:$0xff]  ;;  %v1854_v16 = vadd.f32 %v2721_v2, %v1834_v50  ;;  %v1840_v25 = vld [vmem:[#allocation2 + $0x60] sm:$0xff]  ;;  %v2409_v34 = vpack.c.bf16 %v1849_v27, %v1848_v12  ;;  %v2414_v17 = vpack.c.bf16 %v1851_v52, %v1850_v55  ;;  %v1857_v21 = vadd.f32 %v2721_v2, %v1837_v11  ;;  %v1841_v29 = vld [vmem:[#allocation2 + $0x70] sm:$0xff] }
 0x283   : > { %v1855_v46 = vadd.f32 %v2721_v2, %v1835_v26  ;;  %v1842_v54 = vld [vmem:[#allocation2 + $0x78] sm:$0xff]  ;;  %v2419_v24 = vpack.c.bf16 %v1853_v42, %v1852_v32  ;;  %v1859_v37 = vadd.f32 %v2721_v2, %v1839_v48  ;;  %v1860_v8 = vadd.f32 %v2721_v2, %v1840_v25 }
 0x284   : > { %v1843_v7 = vld [vmem:[#allocation2 + $0x28] sm:$0xff]  ;;  %2410 = vst [vmem:[%s3228_s14] sm:$0xff] %v2409_v34   ;;  %v2429_v13 = vpack.c.bf16 %v1857_v21, %v1856_v49  ;;  %v1861_v58 = vadd.f32 %v2721_v2, %v1841_v29  ;;  %v1862_v9 = vadd.f32 %v2721_v2, %v1842_v54 }
 0x285   : > { %v2424_v43 = vpack.c.bf16 %v1855_v46, %v1854_v16  ;;  %2446 = vst [vmem:[%s3228_s14 + $0x8] sm:$0xff] %v2414_v17   ;;  %v2434_v14 = vpack.c.bf16 %v1859_v37, %v1858_v47  ;;  %v1863_v63 = vadd.f32 %v2721_v2, %v1843_v7 }
 0x286   : > { %2447 = vst [vmem:[%s3228_s14 + $0x10] sm:$0xff] %v2419_v24   ;;  %v2439_v19 = vpack.c.bf16 %v1861_v58, %v1860_v8 }
 0x287   : > { %2448 = vst [vmem:[%s3228_s14 + $0x18] sm:$0xff] %v2424_v43   ;;  %v2444_v53 = vpack.c.bf16 %v1863_v63, %v1862_v9 }
 0x288   : > { %2449 = vst [vmem:[%s3228_s14 + $0x20] sm:$0xff] %v2429_v13  }
 0x289   : > { %2450 = vst [vmem:[%s3228_s14 + $0x28] sm:$0xff] %v2434_v14  }
 0x28a   : > { %2451 = vst [vmem:[%s3228_s14 + $0x30] sm:$0xff] %v2439_v19  }
 0x28b   : > { %2452 = vst [vmem:[%s3228_s14 + $0x38] sm:$0xff] %v2444_v53  }
 0x28c PF: > { %s4920_s11 = sld [smem:[#allocation20_spill]]  ;;  %s1909_s0 = sshll.u32 %s3228_s14, 4  ;;  %s1910_s0 = int_to_ptr.vmem [resolvable:$true] %s1909_s0 }
 0x28d   : > { %s4921_s13 = sld [smem:[#allocation52_spill]]  ;;  %s1897_s27 = scalar_lea.sflag [#allocation5], %s3202_s18 }
 0x292   : > { %s2405_s9 = sshll.u32 %s4920_s11, 6 }
 0x293   : > { %s1908_s21 = scalar_lea.hbm %s4921_s13, %s2405_s9  ;;  %s2862_s4 = scalar_lea.hbm %s4921_s13, 128 }
 0x294   : > { %s1911_s23 = sshll.u32 %s1908_s21, 4  ;;  %s1912_s23 = int_to_ptr.hbm [resolvable:$true] %s1911_s23 }
 0x295   : > { %s2856_s10 = sshra.s32 %s1912_s23, 4  ;;  %s2857_s10 = int_to_ptr.hbm [resolvable:$true] %s2856_s10 }
 0x296   : > { %s2858_s6 = scalar_lea.hbm %s2857_s10, 64  ;;  %p2863_p4 = scmp.lt.s32.totalorder %s2857_s10, %s4921_s13 }
 0x297   : > { %p2859_p10 = scmp.ne.s32.totalorder %s2857_s10, %s2858_s6  ;;  %p2864_p6 = scmp.lt.s32.totalorder %s2862_s4, %s2858_s6 }
 0x299   : > { %p2860_p13 = pnand %p2859_p10, %p3160_p12  ;;  %p2865_p1 = por %p2864_p6, %p2863_p4 }
 0x29b   : > { %p2861_p2 = pneg %p2860_p13 }
 0x29d   : > { %p2866_p0 = pnand %p2865_p1, %p2861_p2 }
 0x29f   : > { %2869 = shalt.err (!%p2866_p0)
}
 0x2a0   : > { %s2979_s18 = smov 64   ;;  %s2980_s15 = smov 4  }
 0x2a1   : > { %2477 = dma.vmem_to_hbm [thread:$0]  (%p3160_p12), %s1910_s0, 1024, %s1912_s23, %s1897_s27, %s2979_s18, %s2979_s18, %s2980_s15  }
 0x2a2 PF: > { %s4922_s14 = sld [smem:[#allocation17_spill]]  ;;  %p2497_p8 = scmp.ge.s32.totalorder %s2972_s28, 2 }
 0x2a4   : > { %p2493_p9 = pnand %p2497_p8, %p3171_p3 }
 0x2a6   : > { %p2494_p11 = pneg %p2493_p9 }
 0x2a8   : > { %s1926_s8 = sand.u32 1, %s4922_s14  }
 0x2a9   : > { %s1927_s17 = scalar_lea.sflag [#allocation5], %s1926_s8 }
 0x2aa   : > { %2927 = dma.done.wait (%p2494_p11), %s1927_s17, 1024  }
 0x2ab   : > { %2929 = vsyncadd (%p2494_p11), %s1927_s17, 4294966272  ;;  %s27_s28 = sadd.s32 1, %s2972_s28   ;;  %s4924_s1 = sld [smem:[#allocation16_spill]] }
 0x2ac   : > { %p24_p5 = scmp.ge.s32.totalorder %s27_s28, 6   ;;  %s4925_s20 = sld [smem:[#allocation23_spill]] }
 0x2ad   : > { %s4926_s7 = sld [smem:[#allocation18_spill]]  ;;  %s4931_s18 = smov %s2936_s19 }
 0x2ae   : > { %s4927_s23 = sld [smem:[#allocation25_spill]]  ;;  %s4933_s21 = smov %s2948_s22 }
 0x2af   : > { %s4928_s25 = sld [smem:[#allocation21_spill]]  ;;  %s4935_s24 = smov %s2964_s26 }
 0x2b0   : > { %s4929_s11 = sld [smem:[#allocation22_spill]] }
 0x2b1   : > { %s4930_s27 = sld [smem:[#allocation24_spill]]  ;;  %s4932_s19 = smov %s4924_s1 }
 0x2b2   :  { %26 = sbr.rel (!%p24_p5) target bundleno = 18 (0x12), region = 130 }
 0x2b3   : > { %s4934_s22 = smov %s4926_s7 }
 0x2b6   : > { %s4936_s26 = smov %s4929_s11 }
 0x2b7   :  { %1933 = vsyncpa [#allocation4], 1 }
 0x2b8   :  { %1935 = vsyncpa [#allocation4 + $0x1], 1 }
 0x2b9   :  { %1936 = vsyncpa [#allocation7], 1 }
 0x2ba   :  { %1938 = vsyncpa [#allocation7 + $0x1], 1 }
 0x2bb   :  { %1939 = vsyncpa [#allocation10], 1 }
 0x2bc   :  { %1941 = vsyncpa [#allocation10 + $0x1], 1 }
 0x2bd   :  { %1942 = vsyncpa [#allocation5], 1 }
 0x2be   :  { %1944 = vsyncpa [#allocation5 + $0x1], 1 }

</bundles_post_ra>
